<compile_context>
chip_gen: v5e
topology: v5e:2x2
jax: 0.10.0
libtpu: 0.0.40
codegen_flags: <defaults>
</compile_context>

<pallas_src>
import functools

import jax
import jax.numpy as jnp
from jax import lax
from jax.experimental import pallas as pl
from jax.experimental.pallas import tpu as pltpu


# ----------------------------------------------------------------------------
# Kernels
# ----------------------------------------------------------------------------
def _crf_order1_kernel(emits_ref, cur_ref, mask_ref, out_ref, acc_ref,
                       *, n, t_blk):
    """Order-1: log_z factorizes, so each block is a masked streaming reduce.

    Layout (batch on lanes, labels on sublanes):
      emits [t_blk, n, B]   cur [t_blk, B] i32   mask [t_blk, B] f32
      scratch: acc [1, B] f32 carrying sum(lse contributions - gold score)
      out: (1, 1) f32 in SMEM, written at the last sequence block.
    """
    pid_s = pl.program_id(1)
    nb_s = pl.num_programs(1)
    bsz = mask_ref.shape[1]

    @pl.when(pid_s == 0)
    def _init():
        acc_ref[...] = jnp.zeros_like(acc_ref)

    iota_lab = lax.broadcasted_iota(jnp.int32, (n, bsz), 0)

    # Block-local accumulators kept in registers; single writeback at exit.
    logz_blk = jnp.zeros((1, bsz), jnp.float32)
    gold_blk = jnp.zeros((n, bsz), jnp.float32)

    for t in range(t_blk):                       # unrolled
        e_t = emits_ref[t].astype(jnp.float32)   # [n, B] (upcast in-kernel)
        m_t = mask_ref[t:t + 1, :]               # [1, B] f32
        cur_t = cur_ref[t:t + 1, :]              # [1, B] i32

        # gold-path score (mask-gated, including global step 0)
        cur_oh = (iota_lab == cur_t).astype(jnp.float32)
        gold_blk = gold_blk + e_t * cur_oh * m_t

        # lse over labels; global step 0 contributes unconditionally
        mx = jnp.max(e_t, axis=0, keepdims=True)
        lse = jnp.log(jnp.sum(jnp.exp(e_t - mx), axis=0, keepdims=True)) + mx
        if t == 0:
            w = jnp.maximum(m_t, (pid_s == 0).astype(jnp.float32))
        else:
            w = m_t
        logz_blk = logz_blk + lse * w

    acc_ref[...] = acc_ref[...] + (
        logz_blk - jnp.sum(gold_blk, axis=0, keepdims=True))

    @pl.when(pid_s == nb_s - 1)
    def _fin():
        out_ref[0, 0] = jnp.sum(acc_ref[...])


def _crf_order2_kernel(emits_ref, prev_ref, cur_ref, mask_ref, out_ref,
                       alpha_ref, score_ref, *, n, t_blk, bos_index):
    """Order-2: forward (alpha) recursion, alpha register-resident per block.

    Layout:
      emits [t_blk, n_prev, n_cur, B]   prev/cur [t_blk, B] i32   mask f32
      scratch: alpha [n, B] f32, gold-score [n, B] f32 (carried over seq blocks)
      out: (1, 1) f32 in SMEM, written at the last sequence block.
    """
    pid_s = pl.program_id(1)
    nb_s = pl.num_programs(1)
    bsz = mask_ref.shape[1]

    @pl.when(pid_s == 0)
    def _init():
        alpha_ref[...] = emits_ref[0][bos_index].astype(jnp.float32)  # [n, B]
        score_ref[...] = jnp.zeros_like(score_ref)

    iota_lab = lax.broadcasted_iota(jnp.int32, (n, bsz), 0)

    alpha = alpha_ref[...]                        # load once per block
    gold_blk = jnp.zeros((n, bsz), jnp.float32)
    not_first = (pid_s > 0).astype(jnp.float32)

    for t in range(t_blk):                        # unrolled
        e_t = emits_ref[t].astype(jnp.float32)    # [n_prev, n_cur, B]
        m_t = mask_ref[t:t + 1, :]                # [1, B]
        prev_t = prev_ref[t:t + 1, :]
        cur_t = cur_ref[t:t + 1, :]

        # gold-path score (mask-gated)
        prev_oh = (iota_lab == prev_t).astype(jnp.float32)        # [n, B]
        cur_oh = (iota_lab == cur_t).astype(jnp.float32)          # [n, B]
        e_sel = jnp.sum(e_t * prev_oh[:, None, :], axis=0)        # [n_cur, B]
        gold_blk = gold_blk + e_sel * cur_oh * m_t

        # alpha recursion step (global step 0 is the init -> skipped via mask)
        sc = alpha[:, None, :] + e_t                              # [np, nc, B]
        mx = jnp.max(sc, axis=0)                                  # [n_cur, B]
        new = jnp.log(jnp.sum(jnp.exp(sc - mx[None]), axis=0)) + mx
        m_eff = m_t * not_first if t == 0 else m_t
        alpha = jnp.where(m_eff > 0.5, new, alpha)

    alpha_ref[...] = alpha                        # single writeback per block
    score_ref[...] = score_ref[...] + gold_blk

    @pl.when(pid_s == nb_s - 1)
    def _fin():
        a = alpha_ref[...]
        mx = jnp.max(a, axis=0, keepdims=True)
        log_z_b = jnp.log(jnp.sum(jnp.exp(a - mx), axis=0, keepdims=True)) + mx
        out_ref[0, 0] = jnp.sum(log_z_b) - jnp.sum(score_ref[...])


# ----------------------------------------------------------------------------
# Wrapper
# ----------------------------------------------------------------------------
def crf_loss(emits, targets, mask, *, order, n_labels, bos_index, pad_index=0,
             t_blk_cap=64):
    """Pallas CRF forward loss.

    emits:   [B, S, n_labels**order]  float (f32 or bf16; upcast in-kernel)
    targets: [B, S + order - 1]       int
    mask:    [B, S]                   bool
    """
    assert order in (1, 2)
    B, S, L = emits.shape
    n = n_labels
    assert L == n ** order
    assert targets.shape == (B, S + order - 1)
    assert mask.shape == (B, S)

    # Token count / final division live in the wrapper, not the kernel.
    # NOTE: faithful to the reference -- no guard against an all-false mask.
    total_tokens = jnp.sum(mask.astype(jnp.float32))

    # ---- batch tiling: 128 lanes per block when possible; "parallel" axis
    #      lets both v7x TensorCores work on independent batch tiles.
    b_blk = 128 if (B % 128 == 0) else B
    n_btiles = B // b_blk

    # ---- timestep block from a VMEM budget (v7x-safe), multiple of 8.
    esize = jnp.dtype(emits.dtype).itemsize
    n_tgt = 1 if order == 1 else 2
    per_step = n ** order * b_blk * esize + (n_tgt + 1) * b_blk * 4
    budget = 24 * 1024 * 1024                     # double-buffered pipeline
    t_fit = max(8, (budget // (2 * per_step)) // 8 * 8)
    t_cap = int(max(8, min(t_blk_cap, t_fit)))
    s_pad8 = -(-S // 8) * 8
    t_blk = int(min(t_cap, s_pad8))
    n_sblk = -(-S // t_blk)
    S_pad = n_sblk * t_blk

    # ---- pad the sequence axis (zero emissions, mask=0, dummy targets).
    if S_pad != S:
        p = S_pad - S
        emits = jnp.pad(emits, ((0, 0), (0, p), (0, 0)))
        mask = jnp.pad(mask, ((0, 0), (0, p)))
        targets = jnp.pad(targets, ((0, 0), (0, p)))

    # ---- lane-dense relayout in the *native* dtype (no f32 cast here).
    if order == 1:
        emits_t = jnp.transpose(emits, (1, 2, 0))                # [S, n, B]
        e_spec = pl.BlockSpec((t_blk, n, b_blk), lambda b, s: (s, 0, b))
    else:
        e4 = emits.reshape(B, S_pad, n, n)                       # (prev, cur)
        emits_t = jnp.transpose(e4, (1, 2, 3, 0))                # [S, n, n, B]
        e_spec = pl.BlockSpec((t_blk, n, n, b_blk), lambda b, s: (s, 0, 0, b))

    tgt = targets.astype(jnp.int32)
    if order == 1:
        tgt_inputs = (jnp.transpose(tgt),)                       # cur  [S, B]
    else:
        tgt_inputs = (jnp.transpose(tgt[:, :-1]),                # prev [S, B]
                      jnp.transpose(tgt[:, 1:]))                 # cur  [S, B]
    mask_t = jnp.transpose(mask).astype(jnp.float32)             # [S, B]

    sb_spec = pl.BlockSpec((t_blk, b_blk), lambda b, s: (s, b))
    in_specs = [e_spec] + [sb_spec] * (len(tgt_inputs) + 1)

    if order == 1:
        kernel = functools.partial(_crf_order1_kernel, n=n, t_blk=t_blk)
        scratch = [pltpu.VMEM((1, b_blk), jnp.float32)]      # sum(lse - gold)
    else:
        kernel = functools.partial(_crf_order2_kernel, n=n, t_blk=t_blk,
                                   bos_index=bos_index)
        scratch = [pltpu.VMEM((n, b_blk), jnp.float32),      # log_alpha carry
                   pltpu.VMEM((n, b_blk), jnp.float32)]      # gold-score carry

    partials = pl.pallas_call(
        kernel,
        out_shape=jax.ShapeDtypeStruct((n_btiles, 1), jnp.float32),
        grid_spec=pltpu.PrefetchScalarGridSpec(
            num_scalar_prefetch=0,
            grid=(n_btiles, n_sblk),
            in_specs=in_specs,
            out_specs=pl.BlockSpec((1, 1), lambda b, s: (b, 0),
                                   memory_space=pltpu.MemorySpace.SMEM),
            scratch_shapes=scratch),
        compiler_params=pltpu.CompilerParams(
            dimension_semantics=("parallel", "arbitrary"),
            vmem_limit_bytes=48 * 1024 * 1024),   # v7x-safe (64 MiB physical)
    )(emits_t, *tgt_inputs, mask_t)

    return jnp.sum(partials) / total_tokens


# ----------------------------------------------------------------------------
# Pure-JAX reference (mirrors the PyTorch forward, in f32)
# ----------------------------------------------------------------------------
def crf_loss_ref(emits, targets, mask, *, order, n_labels, bos_index):
    B, S, L = emits.shape
    emits_t = jnp.transpose(emits, (1, 0, 2)).astype(jnp.float32)
    tgt = jnp.transpose(targets).astype(jnp.int32)
    mask_t = jnp.transpose(mask)
    if order == 2:
        tgt = tgt[:-1] * n_labels + tgt[1:]
    gathered = jnp.take_along_axis(emits_t, tgt[:, :, None], axis=-1)[..., 0]
    scores = jnp.sum(gathered * mask_t.astype(jnp.float32))
    if order == 1:
        la = emits_t[0]
    else:
        la = emits_t[0].reshape(B, n_labels, n_labels)[:, bos_index, :]
    for i in range(1, S):
        e = emits_t[i]
        if order == 1:
            sc = la[:, :, None] + e[:, None, :]
        else:
            sc = la[:, :, None] + e.reshape(B, n_labels, n_labels)
        tmp = jax.scipy.special.logsumexp(sc, axis=1)
        la = jnp.where(mask_t[i][:, None], tmp, la)
    log_z = jnp.sum(jax.scipy.special.logsumexp(la, axis=1))
    return (log_z - scores) / jnp.sum(mask_t.astype(jnp.float32))


if __name__ == "__main__":
    key = jax.random.PRNGKey(0)
    B, S, n_labels = 2, 21, 8          # S=21 -> padded to 24 (exercises pad)
    bos_index, pad_index = 0, 0

    k1, k2, k3 = jax.random.split(key, 3)
    lengths = jnp.array([S, 13], dtype=jnp.int32)
    mask = jnp.arange(S)[None, :] < lengths[:, None]               # [B, S] bool

    # ---- order = 2, multi-block streaming (t_blk capped at 8 -> 3 blocks) ---
    emits2 = jax.random.normal(k1, (B, S, n_labels ** 2), dtype=jnp.float32)
    targets2 = jax.random.randint(k2, (B, S + 1), 0, n_labels, dtype=jnp.int32)
    loss2 = crf_loss(emits2, targets2, mask, order=2, n_labels=n_labels,
                     bos_index=bos_index, pad_index=pad_index, t_blk_cap=8)
    jax.block_until_ready(loss2)
    ref2 = crf_loss_ref(emits2, targets2, mask, order=2,
                        n_labels=n_labels, bos_index=bos_index)
    assert abs(float(loss2) - float(ref2)) < 1e-3 * max(1.0, abs(float(ref2))), \
        (float(loss2), float(ref2))

    # ---- order = 1 (factorized log-Z), multi-block ---------------------------
    emits1 = jax.random.normal(k3, (B, S, n_labels), dtype=jnp.float32)
    targets1 = targets2[:, :S]
    loss1 = crf_loss(emits1, targets1, mask, order=1, n_labels=n_labels,
                     bos_index=bos_index, pad_index=pad_index, t_blk_cap=8)
    jax.block_until_ready(loss1)
    ref1 = crf_loss_ref(emits1, targets1, mask, order=1,
                        n_labels=n_labels, bos_index=bos_index)
    assert abs(float(loss1) - float(ref1)) < 1e-3 * max(1.0, abs(float(ref1))), \
        (float(loss1), float(ref1))

    # ---- bf16 ingest path (emissions DMA'd in bf16, upcast inside kernel) ----
    emits2_bf = emits2.astype(jnp.bfloat16)
    loss2_bf = crf_loss(emits2_bf, targets2, mask, order=2, n_labels=n_labels,
                        bos_index=bos_index, pad_index=pad_index)
    jax.block_until_ready(loss2_bf)
    ref2_bf = crf_loss_ref(emits2_bf.astype(jnp.float32), targets2, mask,
                           order=2, n_labels=n_labels, bos_index=bos_index)
    assert abs(float(loss2_bf) - float(ref2_bf)) < 5e-3 * max(1.0, abs(float(ref2_bf))), \
        (float(loss2_bf), float(ref2_bf))

    print("KERNEL_OK")
</pallas_src>

<mosaic_0001>
module attributes {stable_mosaic.version = 11 : i64} {
  func.func @_crf_order2_kernel(%arg0: i32, %arg1: i32, %arg2: memref<8x8x8x2xf32, #tpu.memory_space<vmem>>, %arg3: memref<8x2xi32, #tpu.memory_space<vmem>>, %arg4: memref<8x2xi32, #tpu.memory_space<vmem>>, %arg5: memref<8x2xf32, #tpu.memory_space<vmem>>, %arg6: memref<1x1xf32, #tpu.memory_space<smem>>, %arg7: memref<8x2xf32, #tpu.memory_space<vmem>>, %arg8: memref<8x2xf32, #tpu.memory_space<vmem>>) attributes {dimension_semantics = [#tpu.dimension_semantics<parallel>, #tpu.dimension_semantics<arbitrary>], iteration_bounds = array<i64: 1, 3>, scalar_prefetch = 0 : i64, scratch_operands = 2 : i64, tpu.core_type = #tpu.core_type<tc>, window_params = [{transform_indices = @transform_0, window_bounds = array<i64: 8, 8, 8, 2>}, {transform_indices = @transform_1, window_bounds = array<i64: 8, 2>}, {transform_indices = @transform_2, window_bounds = array<i64: 8, 2>}, {transform_indices = @transform_3, window_bounds = array<i64: 8, 2>}, {transform_indices = @transform_4, window_bounds = array<i64: 1, 1>}]} {
    %c0_i32 = arith.constant 0 : i32
    %0 = arith.cmpi eq, %arg1, %c0_i32 : i32
    %1 = arith.extui %0 : i1 to i32
    %c0_i32_0 = arith.constant 0 : i32
    %2 = arith.cmpi ne, %1, %c0_i32_0 : i32
    scf.if %2 {
      %c0_115 = arith.constant 0 : index
      %c0_116 = arith.constant 0 : index
      %c0_117 = arith.constant 0 : index
      %c0_118 = arith.constant 0 : index
      %314 = vector.load %arg2[%c0_115, %c0_116, %c0_117, %c0_118] : memref<8x8x8x2xf32, #tpu.memory_space<vmem>>, vector<1x8x8x2xf32>
      %315 = vector.shape_cast %314 : vector<1x8x8x2xf32> to vector<8x8x2xf32>
      %316 = vector.extract_strided_slice %315 {offsets = [0, 0, 0], sizes = [1, 8, 2], strides = [1, 1, 1]} : vector<8x8x2xf32> to vector<1x8x2xf32>
      %317 = vector.shape_cast %316 : vector<1x8x2xf32> to vector<8x2xf32>
      %c0_119 = arith.constant 0 : index
      %c0_120 = arith.constant 0 : index
      %318 = vector.load %arg7[%c0_119, %c0_120] : memref<8x2xf32, #tpu.memory_space<vmem>>, vector<8x2xf32>
      tpu.vector_store %arg7[%c0_119, %c0_120], %317 {strides = array<i32>} : memref<8x2xf32, #tpu.memory_space<vmem>>, vector<8x2xf32>,
      %cst_121 = arith.constant 0.000000e+00 : f32
      %319 = vector.broadcast %cst_121 : f32 to vector<8x2xf32>
      %c0_122 = arith.constant 0 : index
      %c0_123 = arith.constant 0 : index
      %320 = vector.load %arg8[%c0_122, %c0_123] : memref<8x2xf32, #tpu.memory_space<vmem>>, vector<8x2xf32>
      tpu.vector_store %arg8[%c0_122, %c0_123], %319 {strides = array<i32>} : memref<8x2xf32, #tpu.memory_space<vmem>>, vector<8x2xf32>,
    } else {
    }
    %3 = tpu.iota {dimensions = array<i32: 0>} : vector<8x2xi32>
    %c0 = arith.constant 0 : index
    %c0_1 = arith.constant 0 : index
    %4 = vector.load %arg7[%c0, %c0_1] : memref<8x2xf32, #tpu.memory_space<vmem>>, vector<8x2xf32>
    %cst = arith.constant 0.000000e+00 : f32
    %5 = vector.broadcast %cst : f32 to vector<8x2xf32>
    %c0_i32_2 = arith.constant 0 : i32
    %6 = arith.cmpi sgt, %arg1, %c0_i32_2 : i32
    %7 = arith.extui %6 : i1 to i32
    %8 = arith.sitofp %7 : i32 to f32
    %c0_3 = arith.constant 0 : index
    %c0_4 = arith.constant 0 : index
    %c0_5 = arith.constant 0 : index
    %c0_6 = arith.constant 0 : index
    %9 = vector.load %arg2[%c0_3, %c0_4, %c0_5, %c0_6] : memref<8x8x8x2xf32, #tpu.memory_space<vmem>>, vector<1x8x8x2xf32>
    %10 = vector.shape_cast %9 : vector<1x8x8x2xf32> to vector<8x8x2xf32>
    %c0_7 = arith.constant 0 : index
    %c0_8 = arith.constant 0 : index
    %11 = vector.load %arg5[%c0_7, %c0_8] : memref<8x2xf32, #tpu.memory_space<vmem>>, vector<1x2xf32>
    %c0_9 = arith.constant 0 : index
    %c0_10 = arith.constant 0 : index
    %12 = vector.load %arg3[%c0_9, %c0_10] : memref<8x2xi32, #tpu.memory_space<vmem>>, vector<1x2xi32>
    %c0_11 = arith.constant 0 : index
    %c0_12 = arith.constant 0 : index
    %13 = vector.load %arg4[%c0_11, %c0_12] : memref<8x2xi32, #tpu.memory_space<vmem>>, vector<1x2xi32>
    %14 = vector.broadcast %12 : vector<1x2xi32> to vector<8x2xi32>
    %15 = arith.cmpi eq, %3, %14 : vector<8x2xi32>
    %16 = arith.extui %15 : vector<8x2xi1> to vector<8x2xi32>
    %17 = arith.sitofp %16 : vector<8x2xi32> to vector<8x2xf32>
    %18 = vector.broadcast %13 : vector<1x2xi32> to vector<8x2xi32>
    %19 = arith.cmpi eq, %3, %18 : vector<8x2xi32>
    %20 = arith.extui %19 : vector<8x2xi1> to vector<8x2xi32>
    %21 = arith.sitofp %20 : vector<8x2xi32> to vector<8x2xf32>
    %22 = vector.shape_cast %17 : vector<8x2xf32> to vector<8x1x2xf32>
    %23 = vector.broadcast %22 : vector<8x1x2xf32> to vector<8x8x2xf32>
    %24 = arith.mulf %10, %23 : vector<8x8x2xf32>
    %cst_13 = arith.constant dense<0.000000e+00> : vector<8x2xf32>
    %25 = vector.multi_reduction <add>, %24, %cst_13 [0] : vector<8x8x2xf32> to vector<8x2xf32>
    %26 = arith.mulf %25, %21 : vector<8x2xf32>
    %27 = vector.broadcast %11 : vector<1x2xf32> to vector<8x2xf32>
    %28 = arith.mulf %26, %27 : vector<8x2xf32>
    %29 = arith.addf %5, %28 : vector<8x2xf32>
    %30 = vector.shape_cast %4 : vector<8x2xf32> to vector<8x1x2xf32>
    %31 = vector.broadcast %30 : vector<8x1x2xf32> to vector<8x8x2xf32>
    %32 = arith.addf %31, %10 : vector<8x8x2xf32>
    %cst_14 = arith.constant dense<0xFF800000> : vector<8x2xf32>
    %33 = vector.multi_reduction <maximumf>, %32, %cst_14 [0] : vector<8x8x2xf32> to vector<8x2xf32>
    %34 = vector.shape_cast %33 : vector<8x2xf32> to vector<1x8x2xf32>
    %35 = vector.broadcast %34 : vector<1x8x2xf32> to vector<8x8x2xf32>
    %36 = arith.subf %32, %35 : vector<8x8x2xf32>
    %37 = math.exp %36 : vector<8x8x2xf32>
    %cst_15 = arith.constant dense<0.000000e+00> : vector<8x2xf32>
    %38 = vector.multi_reduction <add>, %37, %cst_15 [0] : vector<8x8x2xf32> to vector<8x2xf32>
    %39 = math.log %38 : vector<8x2xf32>
    %40 = arith.addf %39, %33 : vector<8x2xf32>
    %41 = vector.broadcast %8 : f32 to vector<1x2xf32>
    %42 = arith.mulf %11, %41 : vector<1x2xf32>
    %cst_16 = arith.constant 5.000000e-01 : f32
    %43 = vector.broadcast %cst_16 : f32 to vector<1x2xf32>
    %44 = arith.cmpf ogt, %42, %43 : vector<1x2xf32>
    %45 = vector.shape_cast %44 : vector<1x2xi1> to vector<1x2xi1>
    %46 = vector.broadcast %45 : vector<1x2xi1> to vector<8x2xi1>
    %47 = arith.select %46, %40, %4 : vector<8x2xi1>, vector<8x2xf32>
    %c1 = arith.constant 1 : index
    %c0_17 = arith.constant 0 : index
    %c0_18 = arith.constant 0 : index
    %c0_19 = arith.constant 0 : index
    %48 = vector.load %arg2[%c1, %c0_17, %c0_18, %c0_19] : memref<8x8x8x2xf32, #tpu.memory_space<vmem>>, vector<1x8x8x2xf32>
    %49 = vector.shape_cast %48 : vector<1x8x8x2xf32> to vector<8x8x2xf32>
    %c1_20 = arith.constant 1 : index
    %c0_21 = arith.constant 0 : index
    %50 = vector.load %arg5[%c1_20, %c0_21] : memref<8x2xf32, #tpu.memory_space<vmem>>, vector<1x2xf32>
    %c1_22 = arith.constant 1 : index
    %c0_23 = arith.constant 0 : index
    %51 = vector.load %arg3[%c1_22, %c0_23] : memref<8x2xi32, #tpu.memory_space<vmem>>, vector<1x2xi32>
    %c1_24 = arith.constant 1 : index
    %c0_25 = arith.constant 0 : index
    %52 = vector.load %arg4[%c1_24, %c0_25] : memref<8x2xi32, #tpu.memory_space<vmem>>, vector<1x2xi32>
    %53 = vector.broadcast %51 : vector<1x2xi32> to vector<8x2xi32>
    %54 = arith.cmpi eq, %3, %53 : vector<8x2xi32>
    %55 = arith.extui %54 : vector<8x2xi1> to vector<8x2xi32>
    %56 = arith.sitofp %55 : vector<8x2xi32> to vector<8x2xf32>
    %57 = vector.broadcast %52 : vector<1x2xi32> to vector<8x2xi32>
    %58 = arith.cmpi eq, %3, %57 : vector<8x2xi32>
    %59 = arith.extui %58 : vector<8x2xi1> to vector<8x2xi32>
    %60 = arith.sitofp %59 : vector<8x2xi32> to vector<8x2xf32>
    %61 = vector.shape_cast %56 : vector<8x2xf32> to vector<8x1x2xf32>
    %62 = vector.broadcast %61 : vector<8x1x2xf32> to vector<8x8x2xf32>
    %63 = arith.mulf %49, %62 : vector<8x8x2xf32>
    %cst_26 = arith.constant dense<0.000000e+00> : vector<8x2xf32>
    %64 = vector.multi_reduction <add>, %63, %cst_26 [0] : vector<8x8x2xf32> to vector<8x2xf32>
    %65 = arith.mulf %64, %60 : vector<8x2xf32>
    %66 = vector.broadcast %50 : vector<1x2xf32> to vector<8x2xf32>
    %67 = arith.mulf %65, %66 : vector<8x2xf32>
    %68 = arith.addf %29, %67 : vector<8x2xf32>
    %69 = vector.shape_cast %47 : vector<8x2xf32> to vector<8x1x2xf32>
    %70 = vector.broadcast %69 : vector<8x1x2xf32> to vector<8x8x2xf32>
    %71 = arith.addf %70, %49 : vector<8x8x2xf32>
    %cst_27 = arith.constant dense<0xFF800000> : vector<8x2xf32>
    %72 = vector.multi_reduction <maximumf>, %71, %cst_27 [0] : vector<8x8x2xf32> to vector<8x2xf32>
    %73 = vector.shape_cast %72 : vector<8x2xf32> to vector<1x8x2xf32>
    %74 = vector.broadcast %73 : vector<1x8x2xf32> to vector<8x8x2xf32>
    %75 = arith.subf %71, %74 : vector<8x8x2xf32>
    %76 = math.exp %75 : vector<8x8x2xf32>
    %cst_28 = arith.constant dense<0.000000e+00> : vector<8x2xf32>
    %77 = vector.multi_reduction <add>, %76, %cst_28 [0] : vector<8x8x2xf32> to vector<8x2xf32>
    %78 = math.log %77 : vector<8x2xf32>
    %79 = arith.addf %78, %72 : vector<8x2xf32>
    %cst_29 = arith.constant 5.000000e-01 : f32
    %80 = vector.broadcast %cst_29 : f32 to vector<1x2xf32>
    %81 = arith.cmpf ogt, %50, %80 : vector<1x2xf32>
    %82 = vector.shape_cast %81 : vector<1x2xi1> to vector<1x2xi1>
    %83 = vector.broadcast %82 : vector<1x2xi1> to vector<8x2xi1>
    %84 = arith.select %83, %79, %47 : vector<8x2xi1>, vector<8x2xf32>
    %c2 = arith.constant 2 : index
    %c0_30 = arith.constant 0 : index
    %c0_31 = arith.constant 0 : index
    %c0_32 = arith.constant 0 : index
    %85 = vector.load %arg2[%c2, %c0_30, %c0_31, %c0_32] : memref<8x8x8x2xf32, #tpu.memory_space<vmem>>, vector<1x8x8x2xf32>
    %86 = vector.shape_cast %85 : vector<1x8x8x2xf32> to vector<8x8x2xf32>
    %c2_33 = arith.constant 2 : index
    %c0_34 = arith.constant 0 : index
    %87 = vector.load %arg5[%c2_33, %c0_34] : memref<8x2xf32, #tpu.memory_space<vmem>>, vector<1x2xf32>
    %c2_35 = arith.constant 2 : index
    %c0_36 = arith.constant 0 : index
    %88 = vector.load %arg3[%c2_35, %c0_36] : memref<8x2xi32, #tpu.memory_space<vmem>>, vector<1x2xi32>
    %c2_37 = arith.constant 2 : index
    %c0_38 = arith.constant 0 : index
    %89 = vector.load %arg4[%c2_37, %c0_38] : memref<8x2xi32, #tpu.memory_space<vmem>>, vector<1x2xi32>
    %90 = vector.broadcast %88 : vector<1x2xi32> to vector<8x2xi32>
    %91 = arith.cmpi eq, %3, %90 : vector<8x2xi32>
    %92 = arith.extui %91 : vector<8x2xi1> to vector<8x2xi32>
    %93 = arith.sitofp %92 : vector<8x2xi32> to vector<8x2xf32>
    %94 = vector.broadcast %89 : vector<1x2xi32> to vector<8x2xi32>
    %95 = arith.cmpi eq, %3, %94 : vector<8x2xi32>
    %96 = arith.extui %95 : vector<8x2xi1> to vector<8x2xi32>
    %97 = arith.sitofp %96 : vector<8x2xi32> to vector<8x2xf32>
    %98 = vector.shape_cast %93 : vector<8x2xf32> to vector<8x1x2xf32>
    %99 = vector.broadcast %98 : vector<8x1x2xf32> to vector<8x8x2xf32>
    %100 = arith.mulf %86, %99 : vector<8x8x2xf32>
    %cst_39 = arith.constant dense<0.000000e+00> : vector<8x2xf32>
    %101 = vector.multi_reduction <add>, %100, %cst_39 [0] : vector<8x8x2xf32> to vector<8x2xf32>
    %102 = arith.mulf %101, %97 : vector<8x2xf32>
    %103 = vector.broadcast %87 : vector<1x2xf32> to vector<8x2xf32>
    %104 = arith.mulf %102, %103 : vector<8x2xf32>
    %105 = arith.addf %68, %104 : vector<8x2xf32>
    %106 = vector.shape_cast %84 : vector<8x2xf32> to vector<8x1x2xf32>
    %107 = vector.broadcast %106 : vector<8x1x2xf32> to vector<8x8x2xf32>
    %108 = arith.addf %107, %86 : vector<8x8x2xf32>
    %cst_40 = arith.constant dense<0xFF800000> : vector<8x2xf32>
    %109 = vector.multi_reduction <maximumf>, %108, %cst_40 [0] : vector<8x8x2xf32> to vector<8x2xf32>
    %110 = vector.shape_cast %109 : vector<8x2xf32> to vector<1x8x2xf32>
    %111 = vector.broadcast %110 : vector<1x8x2xf32> to vector<8x8x2xf32>
    %112 = arith.subf %108, %111 : vector<8x8x2xf32>
    %113 = math.exp %112 : vector<8x8x2xf32>
    %cst_41 = arith.constant dense<0.000000e+00> : vector<8x2xf32>
    %114 = vector.multi_reduction <add>, %113, %cst_41 [0] : vector<8x8x2xf32> to vector<8x2xf32>
    %115 = math.log %114 : vector<8x2xf32>
    %116 = arith.addf %115, %109 : vector<8x2xf32>
    %cst_42 = arith.constant 5.000000e-01 : f32
    %117 = vector.broadcast %cst_42 : f32 to vector<1x2xf32>
    %118 = arith.cmpf ogt, %87, %117 : vector<1x2xf32>
    %119 = vector.shape_cast %118 : vector<1x2xi1> to vector<1x2xi1>
    %120 = vector.broadcast %119 : vector<1x2xi1> to vector<8x2xi1>
    %121 = arith.select %120, %116, %84 : vector<8x2xi1>, vector<8x2xf32>
    %c3 = arith.constant 3 : index
    %c0_43 = arith.constant 0 : index
    %c0_44 = arith.constant 0 : index
    %c0_45 = arith.constant 0 : index
    %122 = vector.load %arg2[%c3, %c0_43, %c0_44, %c0_45] : memref<8x8x8x2xf32, #tpu.memory_space<vmem>>, vector<1x8x8x2xf32>
    %123 = vector.shape_cast %122 : vector<1x8x8x2xf32> to vector<8x8x2xf32>
    %c3_46 = arith.constant 3 : index
    %c0_47 = arith.constant 0 : index
    %124 = vector.load %arg5[%c3_46, %c0_47] : memref<8x2xf32, #tpu.memory_space<vmem>>, vector<1x2xf32>
    %c3_48 = arith.constant 3 : index
    %c0_49 = arith.constant 0 : index
    %125 = vector.load %arg3[%c3_48, %c0_49] : memref<8x2xi32, #tpu.memory_space<vmem>>, vector<1x2xi32>
    %c3_50 = arith.constant 3 : index
    %c0_51 = arith.constant 0 : index
    %126 = vector.load %arg4[%c3_50, %c0_51] : memref<8x2xi32, #tpu.memory_space<vmem>>, vector<1x2xi32>
    %127 = vector.broadcast %125 : vector<1x2xi32> to vector<8x2xi32>
    %128 = arith.cmpi eq, %3, %127 : vector<8x2xi32>
    %129 = arith.extui %128 : vector<8x2xi1> to vector<8x2xi32>
    %130 = arith.sitofp %129 : vector<8x2xi32> to vector<8x2xf32>
    %131 = vector.broadcast %126 : vector<1x2xi32> to vector<8x2xi32>
    %132 = arith.cmpi eq, %3, %131 : vector<8x2xi32>
    %133 = arith.extui %132 : vector<8x2xi1> to vector<8x2xi32>
    %134 = arith.sitofp %133 : vector<8x2xi32> to vector<8x2xf32>
    %135 = vector.shape_cast %130 : vector<8x2xf32> to vector<8x1x2xf32>
    %136 = vector.broadcast %135 : vector<8x1x2xf32> to vector<8x8x2xf32>
    %137 = arith.mulf %123, %136 : vector<8x8x2xf32>
    %cst_52 = arith.constant dense<0.000000e+00> : vector<8x2xf32>
    %138 = vector.multi_reduction <add>, %137, %cst_52 [0] : vector<8x8x2xf32> to vector<8x2xf32>
    %139 = arith.mulf %138, %134 : vector<8x2xf32>
    %140 = vector.broadcast %124 : vector<1x2xf32> to vector<8x2xf32>
    %141 = arith.mulf %139, %140 : vector<8x2xf32>
    %142 = arith.addf %105, %141 : vector<8x2xf32>
    %143 = vector.shape_cast %121 : vector<8x2xf32> to vector<8x1x2xf32>
    %144 = vector.broadcast %143 : vector<8x1x2xf32> to vector<8x8x2xf32>
    %145 = arith.addf %144, %123 : vector<8x8x2xf32>
    %cst_53 = arith.constant dense<0xFF800000> : vector<8x2xf32>
    %146 = vector.multi_reduction <maximumf>, %145, %cst_53 [0] : vector<8x8x2xf32> to vector<8x2xf32>
    %147 = vector.shape_cast %146 : vector<8x2xf32> to vector<1x8x2xf32>
    %148 = vector.broadcast %147 : vector<1x8x2xf32> to vector<8x8x2xf32>
    %149 = arith.subf %145, %148 : vector<8x8x2xf32>
    %150 = math.exp %149 : vector<8x8x2xf32>
    %cst_54 = arith.constant dense<0.000000e+00> : vector<8x2xf32>
    %151 = vector.multi_reduction <add>, %150, %cst_54 [0] : vector<8x8x2xf32> to vector<8x2xf32>
    %152 = math.log %151 : vector<8x2xf32>
    %153 = arith.addf %152, %146 : vector<8x2xf32>
    %cst_55 = arith.constant 5.000000e-01 : f32
    %154 = vector.broadcast %cst_55 : f32 to vector<1x2xf32>
    %155 = arith.cmpf ogt, %124, %154 : vector<1x2xf32>
    %156 = vector.shape_cast %155 : vector<1x2xi1> to vector<1x2xi1>
    %157 = vector.broadcast %156 : vector<1x2xi1> to vector<8x2xi1>
    %158 = arith.select %157, %153, %121 : vector<8x2xi1>, vector<8x2xf32>
    %c4 = arith.constant 4 : index
    %c0_56 = arith.constant 0 : index
    %c0_57 = arith.constant 0 : index
    %c0_58 = arith.constant 0 : index
    %159 = vector.load %arg2[%c4, %c0_56, %c0_57, %c0_58] : memref<8x8x8x2xf32, #tpu.memory_space<vmem>>, vector<1x8x8x2xf32>
    %160 = vector.shape_cast %159 : vector<1x8x8x2xf32> to vector<8x8x2xf32>
    %c4_59 = arith.constant 4 : index
    %c0_60 = arith.constant 0 : index
    %161 = vector.load %arg5[%c4_59, %c0_60] : memref<8x2xf32, #tpu.memory_space<vmem>>, vector<1x2xf32>
    %c4_61 = arith.constant 4 : index
    %c0_62 = arith.constant 0 : index
    %162 = vector.load %arg3[%c4_61, %c0_62] : memref<8x2xi32, #tpu.memory_space<vmem>>, vector<1x2xi32>
    %c4_63 = arith.constant 4 : index
    %c0_64 = arith.constant 0 : index
    %163 = vector.load %arg4[%c4_63, %c0_64] : memref<8x2xi32, #tpu.memory_space<vmem>>, vector<1x2xi32>
    %164 = vector.broadcast %162 : vector<1x2xi32> to vector<8x2xi32>
    %165 = arith.cmpi eq, %3, %164 : vector<8x2xi32>
    %166 = arith.extui %165 : vector<8x2xi1> to vector<8x2xi32>
    %167 = arith.sitofp %166 : vector<8x2xi32> to vector<8x2xf32>
    %168 = vector.broadcast %163 : vector<1x2xi32> to vector<8x2xi32>
    %169 = arith.cmpi eq, %3, %168 : vector<8x2xi32>
    %170 = arith.extui %169 : vector<8x2xi1> to vector<8x2xi32>
    %171 = arith.sitofp %170 : vector<8x2xi32> to vector<8x2xf32>
    %172 = vector.shape_cast %167 : vector<8x2xf32> to vector<8x1x2xf32>
    %173 = vector.broadcast %172 : vector<8x1x2xf32> to vector<8x8x2xf32>
    %174 = arith.mulf %160, %173 : vector<8x8x2xf32>
    %cst_65 = arith.constant dense<0.000000e+00> : vector<8x2xf32>
    %175 = vector.multi_reduction <add>, %174, %cst_65 [0] : vector<8x8x2xf32> to vector<8x2xf32>
    %176 = arith.mulf %175, %171 : vector<8x2xf32>
    %177 = vector.broadcast %161 : vector<1x2xf32> to vector<8x2xf32>
    %178 = arith.mulf %176, %177 : vector<8x2xf32>
    %179 = arith.addf %142, %178 : vector<8x2xf32>
    %180 = vector.shape_cast %158 : vector<8x2xf32> to vector<8x1x2xf32>
    %181 = vector.broadcast %180 : vector<8x1x2xf32> to vector<8x8x2xf32>
    %182 = arith.addf %181, %160 : vector<8x8x2xf32>
    %cst_66 = arith.constant dense<0xFF800000> : vector<8x2xf32>
    %183 = vector.multi_reduction <maximumf>, %182, %cst_66 [0] : vector<8x8x2xf32> to vector<8x2xf32>
    %184 = vector.shape_cast %183 : vector<8x2xf32> to vector<1x8x2xf32>
    %185 = vector.broadcast %184 : vector<1x8x2xf32> to vector<8x8x2xf32>
    %186 = arith.subf %182, %185 : vector<8x8x2xf32>
    %187 = math.exp %186 : vector<8x8x2xf32>
    %cst_67 = arith.constant dense<0.000000e+00> : vector<8x2xf32>
    %188 = vector.multi_reduction <add>, %187, %cst_67 [0] : vector<8x8x2xf32> to vector<8x2xf32>
    %189 = math.log %188 : vector<8x2xf32>
    %190 = arith.addf %189, %183 : vector<8x2xf32>
    %cst_68 = arith.constant 5.000000e-01 : f32
    %191 = vector.broadcast %cst_68 : f32 to vector<1x2xf32>
    %192 = arith.cmpf ogt, %161, %191 : vector<1x2xf32>
    %193 = vector.shape_cast %192 : vector<1x2xi1> to vector<1x2xi1>
    %194 = vector.broadcast %193 : vector<1x2xi1> to vector<8x2xi1>
    %195 = arith.select %194, %190, %158 : vector<8x2xi1>, vector<8x2xf32>
    %c5 = arith.constant 5 : index
    %c0_69 = arith.constant 0 : index
    %c0_70 = arith.constant 0 : index
    %c0_71 = arith.constant 0 : index
    %196 = vector.load %arg2[%c5, %c0_69, %c0_70, %c0_71] : memref<8x8x8x2xf32, #tpu.memory_space<vmem>>, vector<1x8x8x2xf32>
    %197 = vector.shape_cast %196 : vector<1x8x8x2xf32> to vector<8x8x2xf32>
    %c5_72 = arith.constant 5 : index
    %c0_73 = arith.constant 0 : index
    %198 = vector.load %arg5[%c5_72, %c0_73] : memref<8x2xf32, #tpu.memory_space<vmem>>, vector<1x2xf32>
    %c5_74 = arith.constant 5 : index
    %c0_75 = arith.constant 0 : index
    %199 = vector.load %arg3[%c5_74, %c0_75] : memref<8x2xi32, #tpu.memory_space<vmem>>, vector<1x2xi32>
    %c5_76 = arith.constant 5 : index
    %c0_77 = arith.constant 0 : index
    %200 = vector.load %arg4[%c5_76, %c0_77] : memref<8x2xi32, #tpu.memory_space<vmem>>, vector<1x2xi32>
    %201 = vector.broadcast %199 : vector<1x2xi32> to vector<8x2xi32>
    %202 = arith.cmpi eq, %3, %201 : vector<8x2xi32>
    %203 = arith.extui %202 : vector<8x2xi1> to vector<8x2xi32>
    %204 = arith.sitofp %203 : vector<8x2xi32> to vector<8x2xf32>
    %205 = vector.broadcast %200 : vector<1x2xi32> to vector<8x2xi32>
    %206 = arith.cmpi eq, %3, %205 : vector<8x2xi32>
    %207 = arith.extui %206 : vector<8x2xi1> to vector<8x2xi32>
    %208 = arith.sitofp %207 : vector<8x2xi32> to vector<8x2xf32>
    %209 = vector.shape_cast %204 : vector<8x2xf32> to vector<8x1x2xf32>
    %210 = vector.broadcast %209 : vector<8x1x2xf32> to vector<8x8x2xf32>
    %211 = arith.mulf %197, %210 : vector<8x8x2xf32>
    %cst_78 = arith.constant dense<0.000000e+00> : vector<8x2xf32>
    %212 = vector.multi_reduction <add>, %211, %cst_78 [0] : vector<8x8x2xf32> to vector<8x2xf32>
    %213 = arith.mulf %212, %208 : vector<8x2xf32>
    %214 = vector.broadcast %198 : vector<1x2xf32> to vector<8x2xf32>
    %215 = arith.mulf %213, %214 : vector<8x2xf32>
    %216 = arith.addf %179, %215 : vector<8x2xf32>
    %217 = vector.shape_cast %195 : vector<8x2xf32> to vector<8x1x2xf32>
    %218 = vector.broadcast %217 : vector<8x1x2xf32> to vector<8x8x2xf32>
    %219 = arith.addf %218, %197 : vector<8x8x2xf32>
    %cst_79 = arith.constant dense<0xFF800000> : vector<8x2xf32>
    %220 = vector.multi_reduction <maximumf>, %219, %cst_79 [0] : vector<8x8x2xf32> to vector<8x2xf32>
    %221 = vector.shape_cast %220 : vector<8x2xf32> to vector<1x8x2xf32>
    %222 = vector.broadcast %221 : vector<1x8x2xf32> to vector<8x8x2xf32>
    %223 = arith.subf %219, %222 : vector<8x8x2xf32>
    %224 = math.exp %223 : vector<8x8x2xf32>
    %cst_80 = arith.constant dense<0.000000e+00> : vector<8x2xf32>
    %225 = vector.multi_reduction <add>, %224, %cst_80 [0] : vector<8x8x2xf32> to vector<8x2xf32>
    %226 = math.log %225 : vector<8x2xf32>
    %227 = arith.addf %226, %220 : vector<8x2xf32>
    %cst_81 = arith.constant 5.000000e-01 : f32
    %228 = vector.broadcast %cst_81 : f32 to vector<1x2xf32>
    %229 = arith.cmpf ogt, %198, %228 : vector<1x2xf32>
    %230 = vector.shape_cast %229 : vector<1x2xi1> to vector<1x2xi1>
    %231 = vector.broadcast %230 : vector<1x2xi1> to vector<8x2xi1>
    %232 = arith.select %231, %227, %195 : vector<8x2xi1>, vector<8x2xf32>
    %c6 = arith.constant 6 : index
    %c0_82 = arith.constant 0 : index
    %c0_83 = arith.constant 0 : index
    %c0_84 = arith.constant 0 : index
    %233 = vector.load %arg2[%c6, %c0_82, %c0_83, %c0_84] : memref<8x8x8x2xf32, #tpu.memory_space<vmem>>, vector<1x8x8x2xf32>
    %234 = vector.shape_cast %233 : vector<1x8x8x2xf32> to vector<8x8x2xf32>
    %c6_85 = arith.constant 6 : index
    %c0_86 = arith.constant 0 : index
    %235 = vector.load %arg5[%c6_85, %c0_86] : memref<8x2xf32, #tpu.memory_space<vmem>>, vector<1x2xf32>
    %c6_87 = arith.constant 6 : index
    %c0_88 = arith.constant 0 : index
    %236 = vector.load %arg3[%c6_87, %c0_88] : memref<8x2xi32, #tpu.memory_space<vmem>>, vector<1x2xi32>
    %c6_89 = arith.constant 6 : index
    %c0_90 = arith.constant 0 : index
    %237 = vector.load %arg4[%c6_89, %c0_90] : memref<8x2xi32, #tpu.memory_space<vmem>>, vector<1x2xi32>
    %238 = vector.broadcast %236 : vector<1x2xi32> to vector<8x2xi32>
    %239 = arith.cmpi eq, %3, %238 : vector<8x2xi32>
    %240 = arith.extui %239 : vector<8x2xi1> to vector<8x2xi32>
    %241 = arith.sitofp %240 : vector<8x2xi32> to vector<8x2xf32>
    %242 = vector.broadcast %237 : vector<1x2xi32> to vector<8x2xi32>
    %243 = arith.cmpi eq, %3, %242 : vector<8x2xi32>
    %244 = arith.extui %243 : vector<8x2xi1> to vector<8x2xi32>
    %245 = arith.sitofp %244 : vector<8x2xi32> to vector<8x2xf32>
    %246 = vector.shape_cast %241 : vector<8x2xf32> to vector<8x1x2xf32>
    %247 = vector.broadcast %246 : vector<8x1x2xf32> to vector<8x8x2xf32>
    %248 = arith.mulf %234, %247 : vector<8x8x2xf32>
    %cst_91 = arith.constant dense<0.000000e+00> : vector<8x2xf32>
    %249 = vector.multi_reduction <add>, %248, %cst_91 [0] : vector<8x8x2xf32> to vector<8x2xf32>
    %250 = arith.mulf %249, %245 : vector<8x2xf32>
    %251 = vector.broadcast %235 : vector<1x2xf32> to vector<8x2xf32>
    %252 = arith.mulf %250, %251 : vector<8x2xf32>
    %253 = arith.addf %216, %252 : vector<8x2xf32>
    %254 = vector.shape_cast %232 : vector<8x2xf32> to vector<8x1x2xf32>
    %255 = vector.broadcast %254 : vector<8x1x2xf32> to vector<8x8x2xf32>
    %256 = arith.addf %255, %234 : vector<8x8x2xf32>
    %cst_92 = arith.constant dense<0xFF800000> : vector<8x2xf32>
    %257 = vector.multi_reduction <maximumf>, %256, %cst_92 [0] : vector<8x8x2xf32> to vector<8x2xf32>
    %258 = vector.shape_cast %257 : vector<8x2xf32> to vector<1x8x2xf32>
    %259 = vector.broadcast %258 : vector<1x8x2xf32> to vector<8x8x2xf32>
    %260 = arith.subf %256, %259 : vector<8x8x2xf32>
    %261 = math.exp %260 : vector<8x8x2xf32>
    %cst_93 = arith.constant dense<0.000000e+00> : vector<8x2xf32>
    %262 = vector.multi_reduction <add>, %261, %cst_93 [0] : vector<8x8x2xf32> to vector<8x2xf32>
    %263 = math.log %262 : vector<8x2xf32>
    %264 = arith.addf %263, %257 : vector<8x2xf32>
    %cst_94 = arith.constant 5.000000e-01 : f32
    %265 = vector.broadcast %cst_94 : f32 to vector<1x2xf32>
    %266 = arith.cmpf ogt, %235, %265 : vector<1x2xf32>
    %267 = vector.shape_cast %266 : vector<1x2xi1> to vector<1x2xi1>
    %268 = vector.broadcast %267 : vector<1x2xi1> to vector<8x2xi1>
    %269 = arith.select %268, %264, %232 : vector<8x2xi1>, vector<8x2xf32>
    %c7 = arith.constant 7 : index
    %c0_95 = arith.constant 0 : index
    %c0_96 = arith.constant 0 : index
    %c0_97 = arith.constant 0 : index
    %270 = vector.load %arg2[%c7, %c0_95, %c0_96, %c0_97] : memref<8x8x8x2xf32, #tpu.memory_space<vmem>>, vector<1x8x8x2xf32>
    %271 = vector.shape_cast %270 : vector<1x8x8x2xf32> to vector<8x8x2xf32>
    %c7_98 = arith.constant 7 : index
    %c0_99 = arith.constant 0 : index
    %272 = vector.load %arg5[%c7_98, %c0_99] : memref<8x2xf32, #tpu.memory_space<vmem>>, vector<1x2xf32>
    %c7_100 = arith.constant 7 : index
    %c0_101 = arith.constant 0 : index
    %273 = vector.load %arg3[%c7_100, %c0_101] : memref<8x2xi32, #tpu.memory_space<vmem>>, vector<1x2xi32>
    %c7_102 = arith.constant 7 : index
    %c0_103 = arith.constant 0 : index
    %274 = vector.load %arg4[%c7_102, %c0_103] : memref<8x2xi32, #tpu.memory_space<vmem>>, vector<1x2xi32>
    %275 = vector.broadcast %273 : vector<1x2xi32> to vector<8x2xi32>
    %276 = arith.cmpi eq, %3, %275 : vector<8x2xi32>
    %277 = arith.extui %276 : vector<8x2xi1> to vector<8x2xi32>
    %278 = arith.sitofp %277 : vector<8x2xi32> to vector<8x2xf32>
    %279 = vector.broadcast %274 : vector<1x2xi32> to vector<8x2xi32>
    %280 = arith.cmpi eq, %3, %279 : vector<8x2xi32>
    %281 = arith.extui %280 : vector<8x2xi1> to vector<8x2xi32>
    %282 = arith.sitofp %281 : vector<8x2xi32> to vector<8x2xf32>
    %283 = vector.shape_cast %278 : vector<8x2xf32> to vector<8x1x2xf32>
    %284 = vector.broadcast %283 : vector<8x1x2xf32> to vector<8x8x2xf32>
    %285 = arith.mulf %271, %284 : vector<8x8x2xf32>
    %cst_104 = arith.constant dense<0.000000e+00> : vector<8x2xf32>
    %286 = vector.multi_reduction <add>, %285, %cst_104 [0] : vector<8x8x2xf32> to vector<8x2xf32>
    %287 = arith.mulf %286, %282 : vector<8x2xf32>
    %288 = vector.broadcast %272 : vector<1x2xf32> to vector<8x2xf32>
    %289 = arith.mulf %287, %288 : vector<8x2xf32>
    %290 = arith.addf %253, %289 : vector<8x2xf32>
    %291 = vector.shape_cast %269 : vector<8x2xf32> to vector<8x1x2xf32>
    %292 = vector.broadcast %291 : vector<8x1x2xf32> to vector<8x8x2xf32>
    %293 = arith.addf %292, %271 : vector<8x8x2xf32>
    %cst_105 = arith.constant dense<0xFF800000> : vector<8x2xf32>
    %294 = vector.multi_reduction <maximumf>, %293, %cst_105 [0] : vector<8x8x2xf32> to vector<8x2xf32>
    %295 = vector.shape_cast %294 : vector<8x2xf32> to vector<1x8x2xf32>
    %296 = vector.broadcast %295 : vector<1x8x2xf32> to vector<8x8x2xf32>
    %297 = arith.subf %293, %296 : vector<8x8x2xf32>
    %298 = math.exp %297 : vector<8x8x2xf32>
    %cst_106 = arith.constant dense<0.000000e+00> : vector<8x2xf32>
    %299 = vector.multi_reduction <add>, %298, %cst_106 [0] : vector<8x8x2xf32> to vector<8x2xf32>
    %300 = math.log %299 : vector<8x2xf32>
    %301 = arith.addf %300, %294 : vector<8x2xf32>
    %cst_107 = arith.constant 5.000000e-01 : f32
    %302 = vector.broadcast %cst_107 : f32 to vector<1x2xf32>
    %303 = arith.cmpf ogt, %272, %302 : vector<1x2xf32>
    %304 = vector.shape_cast %303 : vector<1x2xi1> to vector<1x2xi1>
    %305 = vector.broadcast %304 : vector<1x2xi1> to vector<8x2xi1>
    %306 = arith.select %305, %301, %269 : vector<8x2xi1>, vector<8x2xf32>
    %c0_108 = arith.constant 0 : index
    %c0_109 = arith.constant 0 : index
    %307 = vector.load %arg7[%c0_108, %c0_109] : memref<8x2xf32, #tpu.memory_space<vmem>>, vector<8x2xf32>
    tpu.vector_store %arg7[%c0_108, %c0_109], %306 {strides = array<i32>} : memref<8x2xf32, #tpu.memory_space<vmem>>, vector<8x2xf32>,
    %c0_110 = arith.constant 0 : index
    %c0_111 = arith.constant 0 : index
    %308 = vector.load %arg8[%c0_110, %c0_111] : memref<8x2xf32, #tpu.memory_space<vmem>>, vector<8x2xf32>
    %309 = arith.addf %308, %290 : vector<8x2xf32>
    %c0_112 = arith.constant 0 : index
    %c0_113 = arith.constant 0 : index
    %310 = vector.load %arg8[%c0_112, %c0_113] : memref<8x2xf32, #tpu.memory_space<vmem>>, vector<8x2xf32>
    tpu.vector_store %arg8[%c0_112, %c0_113], %309 {strides = array<i32>} : memref<8x2xf32, #tpu.memory_space<vmem>>, vector<8x2xf32>,
    %c2_i32 = arith.constant 2 : i32
    %311 = arith.cmpi eq, %arg1, %c2_i32 : i32
    %312 = arith.extui %311 : i1 to i32
    %c0_i32_114 = arith.constant 0 : i32
    %313 = arith.cmpi ne, %312, %c0_i32_114 : i32
    scf.if %313 {
      %c0_115 = arith.constant 0 : index
      %c0_116 = arith.constant 0 : index
      %314 = vector.load %arg7[%c0_115, %c0_116] : memref<8x2xf32, #tpu.memory_space<vmem>>, vector<8x2xf32>
      %cst_117 = arith.constant dense<0xFF800000> : vector<2xf32>
      %315 = vector.multi_reduction <maximumf>, %314, %cst_117 [0] : vector<8x2xf32> to vector<2xf32>
      %316 = vector.shape_cast %315 : vector<2xf32> to vector<1x2xf32>
      %317 = vector.broadcast %316 : vector<1x2xf32> to vector<8x2xf32>
      %318 = arith.subf %314, %317 : vector<8x2xf32>
      %319 = math.exp %318 : vector<8x2xf32>
      %cst_118 = arith.constant dense<0.000000e+00> : vector<2xf32>
      %320 = vector.multi_reduction <add>, %319, %cst_118 [0] : vector<8x2xf32> to vector<2xf32>
      %321 = vector.shape_cast %320 : vector<2xf32> to vector<1x2xf32>
      %322 = math.log %321 : vector<1x2xf32>
      %323 = arith.addf %322, %316 : vector<1x2xf32>
      %324 = vector.shape_cast %323 : vector<1x2xf32> to vector<1x1x2xf32>
      %cst_119 = arith.constant dense<0.000000e+00> : vector<1xf32>
      %325 = vector.multi_reduction <add>, %324, %cst_119 [1, 2] : vector<1x1x2xf32> to vector<1xf32>
      %326 = vector.shape_cast %325 : vector<1xf32> to vector<1x1x1xf32>
      %327 = vector.extract %326[0, 0, 0] : f32 from vector<1x1x1xf32>
      %c0_120 = arith.constant 0 : index
      %c0_121 = arith.constant 0 : index
      %328 = vector.load %arg8[%c0_120, %c0_121] : memref<8x2xf32, #tpu.memory_space<vmem>>, vector<8x2xf32>
      %329 = vector.shape_cast %328 : vector<8x2xf32> to vector<1x8x2xf32>
      %cst_122 = arith.constant dense<0.000000e+00> : vector<1xf32>
      %330 = vector.multi_reduction <add>, %329, %cst_122 [1, 2] : vector<1x8x2xf32> to vector<1xf32>
      %331 = vector.shape_cast %330 : vector<1xf32> to vector<1x1x1xf32>
      %332 = vector.extract %331[0, 0, 0] : f32 from vector<1x1x1xf32>
      %333 = arith.subf %327, %332 : f32
      %c0_123 = arith.constant 0 : index
      %c0_124 = arith.constant 0 : index
      %334 = memref.load %arg6[%c0_123, %c0_124] : memref<1x1xf32, #tpu.memory_space<smem>>
      memref.store %333, %arg6[%c0_123, %c0_124] : memref<1x1xf32, #tpu.memory_space<smem>>
    } else {
    }
    return
  }
  func.func @transform_0(%arg0: i32, %arg1: i32) -> (i32, i32, i32, i32) {
    %c0_i32 = arith.constant 0 : i32
    %c0_i32_0 = arith.constant 0 : i32
    %c0_i32_1 = arith.constant 0 : i32
    return %arg1, %c0_i32, %c0_i32_0, %arg0 : i32, i32, i32, i32
  }
  func.func @transform_1(%arg0: i32, %arg1: i32) -> (i32, i32) {
    %c0_i32 = arith.constant 0 : i32
    return %arg1, %arg0 : i32, i32
  }
  func.func @transform_2(%arg0: i32, %arg1: i32) -> (i32, i32) {
    %c0_i32 = arith.constant 0 : i32
    return %arg1, %arg0 : i32, i32
  }
  func.func @transform_3(%arg0: i32, %arg1: i32) -> (i32, i32) {
    %c0_i32 = arith.constant 0 : i32
    return %arg1, %arg0 : i32, i32
  }
  func.func @transform_4(%arg0: i32, %arg1: i32) -> (i32, i32) {
    %c0_i32 = arith.constant 0 : i32
    %c0_i32_0 = arith.constant 0 : i32
    return %arg0, %c0_i32 : i32, i32
  }
}

</mosaic_0001>

<bundles_post_ra>
// kernel: tpu_custom_call.1
= control target key start
LH: loop header
LB: loop body
LE: loop exit
PB: predicated region body
PF: predicated region fallthrough
CT: control target
= control target key end

     0   :  { %9 = vsyncpa [#allocation5], 0  ;;  %s2170_s15 = smov 0   ;;  %s2172_s16 = smov 0   ;;  %s2900_s0 = inlined_call_operand.vmem [shape: f32[24,8,8,2], index: 0, kind: input, shape index: {}]   ;;  %s2901_s1 = inlined_call_operand.vmem [shape: s32[24,2], index: 1, kind: input, shape index: {}]   ;;  %s2902_s2 = inlined_call_operand.vmem [shape: s32[24,2], index: 2, kind: input, shape index: {}]   ;;  %s2903_s3 = inlined_call_operand.vmem [shape: f32[24,2], index: 3, kind: input, shape index: {}]   ;;  %s2904_s4 = inlined_call_operand.hbm [shape: f32[1,1], index: 4, kind: output, shape index: {}]  }
   0x1   :  { %s2174_s17 = smov 0  }
   0x2 LB: > { %s1800_s18 = sadd.s32 4294967295, %s2139_s17   ;;  %s24_s19 = sadd.s32 1, %s2135_s16  ;;  %s2139_s17 = sphi %s2174_s17, %s15_s17   ;;  %s2135_s16 = sphi %s2172_s16, %s2906_s16   ;;  %s2131_s15 = sphi %s2170_s15, %s2905_s15  }
   0x3   : > { %p25_p0 = scmp.ge.s32.totalorder %s24_s19, 3  ;;  %p1803_p1 = scmp.ge.s32.totalorder %s2139_s17, 1 }
   0x4   : > { %p224_p2 = scmp.lt.s32.totalorder %s2139_s17, 4 }
   0x5   : > { %s2908_s19 = smov (%p25_p0, %s24_s19), 0 }
   0x6   : > { %p225_p3 = pnand %p1803_p1, %p224_p2 }
   0x7   : > { %s1804_s20 = sshll.u32 (!%p225_p3), %s2131_s15, 3  ;;  %p280_p4 = scmp.lt.s32.totalorder (!%p225_p3), %s2131_s15, 2 }
   0x8   : > { %228 = sbr.rel (%p225_p3) target bundleno = 713 (0x2c9), region = 36  ;;  %p271_p5 = scmp.lt.s32.totalorder (!%p225_p3), %s1804_s20, 23 }
   0x9   : > { %p1810_p6 = scmp.ne.s32.totalorder (!%p225_p3), %s2131_s15, 0 }
   0xd   : > { %s281_s21 = scalar_select %p280_p4, %s2131_s15, 2 }
   0xe   : > { %s2910_s20 = smov (!%p271_p5, %s1804_s20), 23  ;;  %304 = sbr.rel (%p1810_p6) target bundleno = 22 (0x16), region = 40 }
   0xf   : > { %s1807_s22 = sshll.u32 %s281_s21, 3  ;;  %s1888_s23 = sshll.u32 %s2910_s20, 6 }
  0x10   : > { %s2197_s26 = scalar_lea.vmem %s2901_s1, %s1807_s22  ;;  %s2202_s29 = scalar_lea.vmem %s2900_s0, %s1888_s23 }
  0x11   : > { %s2207_s6 = scalar_lea.vmem %s2902_s2, %s1807_s22  ;;  %s2212_s9 = scalar_lea.vmem %s2903_s3, %s1807_s22 }
  0x13   : > { %v305_v0 = vld [vmem:[%s2202_s29] sm:$0xff]  ;;  %vm306_vm0 = vcmask 15360   ;;  %v2141_v1 = vmov 0.0  }
  0x14   : > { %307 = vst.msk [vmem:[#allocation2] sm:$0xff] %vm306_vm0, %v305_v0 }
  0x15   : > { %308 = vst.msk [vmem:[#allocation3] sm:$0xff] %vm306_vm0, %v2141_v1 }
  0x16 PF: > { %v309_v2 = vlaneseq  ;;  %v1927_v7 = vld [vmem:[%s2197_s26] ss:$0 sm:$0xff]  ;;  %vm366_vm1 = vcmask 15360   ;;  %v2142_v13 = vmov 0.0   ;;  %v316_v23 = vld [vmem:[%s2202_s29 + $0x8] sm:$0xff]  ;;  %v317_v24 = vld [vmem:[%s2202_s29 + $0x10] sm:$0xff] }
  0x17   : > { %v315_v18 = vld [vmem:[%s2202_s29] sm:$0xff]  ;;  %v318_v25 = vld [vmem:[%s2202_s29 + $0x18] sm:$0xff]  ;;  %v320_v31 = vld [vmem:[%s2202_s29 + $0x28] sm:$0xff]  ;;  %p312_p7 = scmp.gt.s32.totalorder %s2131_s15, 0  ;;  %p1883_p8 = scmp.ne.s32.totalorder %s2131_s15, 2 }
  0x18   : > { %v2218_v4 = vshrl.u32 %v309_v2, 7  ;;  %v319_v26 = vld [vmem:[%s2202_s29 + $0x20] sm:$0xff]  ;;  %v321_v36 = vld [vmem:[%s2202_s29 + $0x30] sm:$0xff]  ;;  %v322_v37 = vld [vmem:[%s2202_s29 + $0x38] sm:$0xff] }
  0x19   : > { %s2268_s10 = scalar_select %p312_p7, 1, 0 }
  0x1a   : > { %vm327_vm2 = vcmp.eq.s32.totalorder %v2218_v4, %v1927_v7 }
  0x1b   : > { %v2216_v3 = vld [vmem:[#allocation2] sm:$0xff]  ;;  %v1811_v14 = vsel %vm327_vm2, 1.0, %v2142_v13  ;;  %s314_s11 = scvt.s32.f32 %s2268_s10 }
  0x1c   : > { %v387_v5 = vrot.slane %v2216_v3, 1  ;;  %v388_v6 = vrot.slane %v2216_v3, 2  ;;  %v389_v8 = vrot.slane %v2216_v3, 3  ;;  %v390_v9 = vrot.slane %v2216_v3, 4 }
  0x1d   : > { %v391_v10 = vrot.slane %v2216_v3, 5  ;;  %v392_v11 = vrot.slane %v2216_v3, 6  ;;  %v393_v12 = vrot.slane %v2216_v3, 7  ;;  %v394_v15 = vperm.slane %v2216_v3, 0 }
  0x1e   : > { %v395_v16 = vperm.slane %v387_v5, 0  ;;  %v396_v17 = vperm.slane %v388_v6, 0  ;;  %v335_v19 = vrot.slane %v1811_v14, 1  ;;  %v336_v20 = vrot.slane %v1811_v14, 2 }
  0x1f   : > { %v337_v21 = vrot.slane %v1811_v14, 3  ;;  %v338_v22 = vrot.slane %v1811_v14, 4  ;;  %v339_v27 = vrot.slane %v1811_v14, 5  ;;  %v340_v28 = vrot.slane %v1811_v14, 6 }
  0x20   : > { %v341_v29 = vrot.slane %v1811_v14, 7  ;;  %v342_v30 = vperm.slane %v1811_v14, 0  ;;  %v343_v32 = vperm.slane %v335_v19, 0  ;;  %v344_v33 = vperm.slane %v336_v20, 0 }
  0x21   : > { %v345_v34 = vperm.slane %v337_v21, 0  ;;  %v346_v35 = vperm.slane %v338_v22, 0  ;;  %v347_v38 = vperm.slane %v339_v27, 0  ;;  %v348_v39 = vperm.slane %v340_v28, 0 }
  0x22   : > { %v349_v40 = vperm.slane %v341_v29, 0  ;;  %v358_v41 = vmul.f32 %v342_v30, %v315_v18  ;;  %v359_v42 = vmul.f32 %v343_v32, %v316_v23  ;;  %v360_v43 = vmul.f32 %v344_v33, %v317_v24 }
  0x23   : > { %v361_v44 = vmul.f32 %v345_v34, %v318_v25  ;;  %v362_v45 = vmul.f32 %v346_v35, %v319_v26  ;;  %v363_v46 = vmul.f32 %v347_v38, %v320_v31  ;;  %v397_v48 = vperm.slane %v389_v8, 0 }
  0x24   : > { %v367_v47 = vsel %vm366_vm1, %v358_v41, 0.0  ;;  %v364_v49 = vmul.f32 %v348_v39, %v321_v36  ;;  %v365_v50 = vmul.f32 %v349_v40, %v322_v37  ;;  %v368_v51 = vsel %vm366_vm1, %v359_v42, 0.0 }
  0x25   : > { %v370_v52 = vsel %vm366_vm1, %v360_v43, 0.0  ;;  %v369_v53 = vadd.f32 %v368_v51, %v367_v47  ;;  %v372_v54 = vsel %vm366_vm1, %v361_v44, 0.0  ;;  %v374_v55 = vsel %vm366_vm1, %v362_v45, 0.0  ;;  %v1930_v47 = vld [vmem:[%s2197_s26 + $0x1] ss:$0 sm:$0xff] }
  0x26   : > { %v376_v56 = vsel %vm366_vm1, %v363_v46, 0.0  ;;  %v398_v57 = vperm.slane %v390_v9, 0  ;;  %v399_v58 = vperm.slane %v391_v10, 0  ;;  %v400_v59 = vperm.slane %v392_v11, 0 }
  0x27   : > { %v401_v60 = vperm.slane %v393_v12, 0  ;;  %v371_v61 = vadd.f32 %v370_v52, %v369_v53  ;;  %v410_v62 = vadd.f32 %v394_v15, %v315_v18  ;;  %v411_v63 = vadd.f32 %v395_v16, %v316_v23 }
  0x28   : > { %v412_v0 = vadd.f32 %v396_v17, %v317_v24  ;;  %v413_v1 = vadd.f32 %v397_v48, %v318_v25  ;;  %v414_v2 = vadd.f32 %v398_v57, %v319_v26  ;;  %v415_v5 = vadd.f32 %v399_v58, %v320_v31 }
  0x29   : > { %v416_v6 = vadd.f32 %v400_v59, %v321_v36  ;;  %v373_v7 = vadd.f32 %v372_v54, %v371_v61  ;;  %v417_v8 = vadd.f32 %v401_v60, %v322_v37  ;;  %v418_v14 = vsel %vm366_vm1, %v410_v62, -inf }
  0x2a   : > { %v419_v19 = vsel %vm366_vm1, %v411_v63, -inf  ;;  %v420_v20 = vsel %vm366_vm1, %v412_v0, -inf  ;;  %v421_v9 = vsel %vm366_vm1, %v413_v1, -inf  ;;  %v422_v10 = vsel %vm366_vm1, %v414_v2, -inf }
  0x2b   : > { %v424_v11 = vsel %vm366_vm1, %v415_v5, -inf  ;;  %v375_v12 = vadd.f32 %v374_v55, %v373_v7  ;;  %v423_v15 = vmax.f32 %v418_v14, %v422_v10  ;;  %v426_v17 = vsel %vm366_vm1, %v416_v6, -inf }
  0x2c   : > { %v425_v16 = vmax.f32 %v419_v19, %v424_v11  ;;  %v378_v18 = vsel %vm366_vm1, %v364_v49, 0.0  ;;  %v427_v21 = vmax.f32 %v420_v20, %v426_v17  ;;  %v428_v22 = vsel %vm366_vm1, %v417_v8, -inf  ;;  %v323_v19 = vld [vmem:[%s2212_s9] sm:$0x1]  ;;  %v2285_v17 = vld [vmem:[%s2202_s29 + $0x48] sm:$0xff] }
  0x2d   : > { %v377_v23 = vadd.f32 %v376_v56, %v375_v12  ;;  %v429_v24 = vmax.f32 %v421_v9, %v428_v22  ;;  %v380_v26 = vsel %vm366_vm1, %v365_v50, 0.0  ;;  %vm495_vm3 = vcmp.eq.s32.totalorder %v2218_v4, %v1930_v47 }
  0x2e   : > { %v430_v25 = vmax.f32 %v423_v15, %v425_v16  ;;  %v1821_v53 = vsel %vm495_vm3, 1.0, %v2142_v13  ;;  %v475_v9 = vstv %s314_s11  ;;  %v2282_v16 = vld [vmem:[%s2202_s29 + $0x40] sm:$0xff] }
  0x2f   : > { %v379_v27 = vadd.f32 %v378_v18, %v377_v23  ;;  %v431_v28 = vmax.f32 %v427_v21, %v429_v24  ;;  %v503_v57 = vrot.slane %v1821_v53, 1  ;;  %v504_v58 = vrot.slane %v1821_v53, 2  ;;  %v2288_v18 = vld [vmem:[%s2202_s29 + $0x50] sm:$0xff]  ;;  %v2291_v24 = vld [vmem:[%s2202_s29 + $0x58] sm:$0xff] }
  0x30   : > { %v505_v61 = vrot.slane %v1821_v53, 3  ;;  %v509_v21 = vrot.slane %v1821_v53, 7 }
  0x31   : > { %v2255_v29 = vadd.f32 %v380_v26, %v379_v27  ;;  %v2257_v30 = vmax.f32 %v430_v25, %v431_v28  ;;  %v511_v7 = vperm.slane %v503_v57, 0 }
  0x32   : > { %v513_v10 = vperm.slane %v505_v61, 0 }
  0x33   : > { %v433_v31 = vsub.f32 %v410_v62, %v2257_v30  ;;  %v434_v32 = vsub.f32 %v411_v63, %v2257_v30  ;;  %v435_v33 = vsub.f32 %v412_v0, %v2257_v30  ;;  %v436_v34 = vsub.f32 %v413_v1, %v2257_v30 }
  0x34   : > { %v437_v35 = vsub.f32 %v414_v2, %v2257_v30  ;;  %v438_v36 = vsub.f32 %v415_v5, %v2257_v30  ;;  %v439_v39 = vsub.f32 %v416_v6, %v2257_v30  ;;  %v440_v42 = vsub.f32 %v417_v8, %v2257_v30 }
  0x35   : > { %v441_v37 = vmul.f32 1.442695, %v433_v31  ;;  %v443_v38 = vmul.f32 1.442695, %v434_v32  ;;  %v445_v40 = vmul.f32 1.442695, %v435_v33  ;;  %v527_v26 = vmul.f32 %v2285_v17, %v511_v7 }
  0x36   : > { %v447_v41 = vmul.f32 1.442695, %v436_v34  ;;  %v449_v43 = vmul.f32 1.442695, %v437_v35  ;;  %v451_v44 = vmul.f32 1.442695, %v438_v36  ;;  %v476_v31 = vmul.f32 %v475_v9, %v323_v19 }
  0x37   : > { %1951 = vpow2.f32 %v441_v37  ;;  %v453_v45 = vmul.f32 1.442695, %v439_v39  ;;  %v455_v46 = vmul.f32 1.442695, %v440_v42  ;;  %v506_v62 = vrot.slane %v1821_v53, 4  ;;  %v2298_v32 = vld [vmem:[%s2202_s29 + $0x60] sm:$0xff] }
  0x38   : > { %1953 = vpow2.f32 %v443_v38  ;;  %v507_v63 = vrot.slane %v1821_v53, 5  ;;  %v508_v5 = vrot.slane %v1821_v53, 6  ;;  %v510_v6 = vperm.slane %v1821_v53, 0  ;;  %v1928_v39 = vld [vmem:[%s2207_s6] ss:$0 sm:$0xff]  ;;  %v1820_v53 = vld [vmem:[%s2202_s29 + $0x78] sm:$0xff] }
  0x39   : > { %1955 = vpow2.f32 %v445_v40  ;;  %v512_v8 = vperm.slane %v504_v58, 0  ;;  %v514_v11 = vperm.slane %v506_v62, 0  ;;  %v529_v34 = vmul.f32 %v2291_v24, %v513_v10 }
  0x3a   : > { %1957 = vpow2.f32 %v447_v41  ;;  %v515_v22 = vperm.slane %v507_v63, 0  ;;  %v526_v25 = vmul.f32 %v2282_v16, %v510_v6  ;;  %v516_v33 = vperm.slane %v508_v5, 0  ;;  %v2307_v41 = vld [vmem:[%s2202_s29 + $0x68] sm:$0xff]  ;;  %v1929_v5 = vld [vmem:[%s2212_s9] ss:$0 sm:$0xff] }
  0x3b   : > { %1959 = vpow2.f32 %v449_v43  ;;  %v528_v27 = vmul.f32 %v2288_v18, %v512_v8  ;;  %v530_v36 = vmul.f32 %v2298_v32, %v514_v11  ;;  %v535_v38 = vsel %vm366_vm1, %v527_v26, 0.0 }
  0x3c   : > { %1961 = vpow2.f32 %v451_v44  ;;  %v534_v37 = vsel %vm366_vm1, %v526_v25, 0.0  ;;  %v539_v47 = vsel %vm366_vm1, %v529_v34, 0.0  ;;  %vm477_vm4 = vcmp.gt.f32.partialorder %v476_v31, 0.5 }
  0x3d   : > { %v1952_v48 = vpop.eup %1951  ;;  %1963 = vpow2.f32 %v453_v45  ;;  %v536_v42 = vadd.f32 %v535_v38, %v534_v37  ;;  %v537_v43 = vsel %vm366_vm1, %v528_v27, 0.0  ;;  %v517_v45 = vperm.slane %v509_v21, 0 }
  0x3e   : > { %v1954_v49 = vpop.eup %1953  ;;  %v457_v50 = vsel %vm366_vm1, %v1952_v48, 0.0  ;;  %1965 = vpow2.f32 %v455_v46  ;;  %v531_v46 = vmul.f32 %v2307_v41, %v515_v22  ;;  %v1819_v48 = vld [vmem:[%s2202_s29 + $0x70] sm:$0xff]  ;;  %vm331_vm5 = vcmp.eq.s32.totalorder %v2218_v4, %v1928_v39 }
  0x3f   : > { %v1956_v51 = vpop.eup %1955  ;;  %v458_v52 = vsel %vm366_vm1, %v1954_v49, 0.0  ;;  %v538_v49 = vadd.f32 %v537_v43, %v536_v42  ;;  %v2143_v58 = vmov 0   ;;  %v1812_v61 = vsel %vm331_vm5, 1.0, %v2142_v13 }
  0x40   : > { %v1958_v54 = vpop.eup %1957  ;;  %v459_v55 = vadd.f32 %v458_v52, %v457_v50  ;;  %v460_v56 = vsel %vm366_vm1, %v1956_v51, 0.0  ;;  %v532_v51 = vmul.f32 %v1819_v48, %v516_v33  ;;  %v541_v52 = vsel %vm366_vm1, %v530_v36, 0.0 }
  0x41   : > { %v1960_v59 = vpop.eup %1959  ;;  %v462_v60 = vsel %vm366_vm1, %v1958_v54, 0.0  ;;  %v1931_v54 = vld [vmem:[%s2207_s6 + $0x1] ss:$0 sm:$0xff]  ;;  %v543_v57 = vsel %vm366_vm1, %v531_v46, 0.0 }
  0x42   : > { %v1962_v0 = vpop.eup %1961  ;;  %v461_v1 = vadd.f32 %v460_v56, %v459_v55  ;;  %v464_v2 = vsel %vm366_vm1, %v1960_v59, 0.0  ;;  %v540_v55 = vadd.f32 %v539_v47, %v538_v49  ;;  %v533_v56 = vmul.f32 %v1820_v53, %v517_v45 }
  0x43   : > { %v1964_v14 = vpop.eup %1963  ;;  %v466_v15 = vsel %vm366_vm1, %v1962_v0, 0.0  ;;  %v478_v59 = vsel %vm477_vm4, 1, %v2143_v58  ;;  %v545_v62 = vsel %vm366_vm1, %v532_v51, 0.0  ;;  %vm499_vm6 = vcmp.eq.s32.totalorder %v2218_v4, %v1931_v54 }
  0x44   : > { %v463_v20 = vadd.f32 %v462_v60, %v461_v1  ;;  %v1966_v12 = vpop.eup %1965  ;;  %v468_v28 = vsel %vm366_vm1, %v1964_v14, 0.0  ;;  %v542_v60 = vadd.f32 %v541_v52, %v540_v55  ;;  %v479_v0 = vperm.slane %v478_v59, 0 }
  0x45   : > { %v470_v40 = vsel %vm366_vm1, %v1966_v12, 0.0  ;;  %v547_v1 = vsel %vm366_vm1, %v533_v56, 0.0  ;;  %v1822_v8 = vsel %vm499_vm6, 1.0, %v2142_v13 }
  0x46   : > { %v465_v23 = vadd.f32 %v464_v2, %v463_v20  ;;  %v544_v63 = vadd.f32 %v543_v57, %v542_v60  ;;  %v382_v2 = vmul.f32 %v1812_v61, %v2255_v29  ;;  %v1932_v20 = vld [vmem:[%s2212_s9 + $0x1] ss:$0 sm:$0xff]  ;;  %vm480_vm7 = vcmp.eq.s32.totalorder %v479_v0, 1 }
  0x48   : > { %v467_v35 = vadd.f32 %v466_v15, %v465_v23  ;;  %v546_v6 = vadd.f32 %v545_v62, %v544_v63  ;;  %v384_v9 = vmul.f32 %v1929_v5, %v382_v2 }
  0x4a   : > { %v469_v44 = vadd.f32 %v468_v28, %v467_v35  ;;  %v548_v19 = vadd.f32 %v547_v1, %v546_v6 }
  0x4c   : > { %v471_v50 = vadd.f32 %v470_v40, %v469_v44  ;;  %v549_v11 = vmul.f32 %v1822_v8, %v548_v19 }
  0x4e   : > { %1967 = vlog2.f32 %v471_v50  ;;  %v551_v15 = vmul.f32 %v1932_v20, %v549_v11  ;;  %v1933_v20 = vld [vmem:[%s2197_s26 + $0x2] ss:$0 sm:$0xff] }
  0x4f   : > { %vm660_vm8 = vcmp.eq.s32.totalorder %v2218_v4, %v1933_v20 }
  0x50   : > { %v2335_v25 = vadd.f32 %v551_v15, %v384_v9 }
  0x54   : > { %v1968_v7 = vpop.eup %1967 }
  0x55   : > { %v473_v14 = vmul.f32 0.6931472, %v1968_v7 }
  0x57   : > { %v474_v10 = vadd.f32 %v473_v14, %v2257_v30 }
  0x59   : > { %v2329_v12 = vsel %vm480_vm7, %v474_v10, %v2216_v3 }
  0x5a   : > { %v554_v21 = vrot.slane %v2329_v12, 1  ;;  %v555_v29 = vrot.slane %v2329_v12, 2  ;;  %v556_v22 = vrot.slane %v2329_v12, 3  ;;  %v557_v23 = vrot.slane %v2329_v12, 4 }
  0x5b   : > { %v558_v26 = vrot.slane %v2329_v12, 5  ;;  %v559_v27 = vrot.slane %v2329_v12, 6  ;;  %v560_v30 = vrot.slane %v2329_v12, 7  ;;  %v561_v3 = vperm.slane %v2329_v12, 0 }
  0x5c   : > { %v562_v28 = vperm.slane %v554_v21, 0  ;;  %v563_v31 = vperm.slane %v555_v29, 0  ;;  %v564_v33 = vperm.slane %v556_v22, 0  ;;  %v565_v34 = vperm.slane %v557_v23, 0 }
  0x5d   : > { %v566_v35 = vperm.slane %v558_v26, 0  ;;  %v567_v36 = vperm.slane %v559_v27, 0  ;;  %v568_v37 = vperm.slane %v560_v30, 0  ;;  %v577_v38 = vadd.f32 %v2282_v16, %v561_v3 }
  0x5e   : > { %v578_v39 = vadd.f32 %v2285_v17, %v562_v28  ;;  %v579_v40 = vadd.f32 %v2288_v18, %v563_v31  ;;  %v580_v42 = vadd.f32 %v2291_v24, %v564_v33  ;;  %v581_v43 = vadd.f32 %v2298_v32, %v565_v34 }
  0x5f   : > { %v582_v44 = vadd.f32 %v2307_v41, %v566_v35  ;;  %v583_v45 = vadd.f32 %v1819_v48, %v567_v36  ;;  %v584_v46 = vadd.f32 %v1820_v53, %v568_v37  ;;  %v585_v47 = vsel %vm366_vm1, %v577_v38, -inf }
  0x60   : > { %v586_v49 = vsel %vm366_vm1, %v578_v39, -inf  ;;  %v587_v50 = vsel %vm366_vm1, %v579_v40, -inf  ;;  %v588_v16 = vsel %vm366_vm1, %v580_v42, -inf  ;;  %v589_v17 = vsel %vm366_vm1, %v581_v43, -inf }
  0x61   : > { %v591_v18 = vsel %vm366_vm1, %v582_v44, -inf  ;;  %v593_v24 = vsel %vm366_vm1, %v583_v45, -inf  ;;  %v595_v32 = vsel %vm366_vm1, %v584_v46, -inf  ;;  %v590_v51 = vmax.f32 %v585_v47, %v589_v17  ;;  %v2381_v17 = vld [vmem:[%s2202_s29 + $0x90] sm:$0xff] }
  0x62   : > { %v592_v41 = vmax.f32 %v586_v49, %v591_v18  ;;  %v594_v48 = vmax.f32 %v587_v50, %v593_v24  ;;  %v596_v52 = vmax.f32 %v588_v16, %v595_v32  ;;  %v1831_v29 = vsel %vm660_vm8, 1.0, %v2142_v13  ;;  %v2375_v50 = vld [vmem:[%s2202_s29 + $0x80] sm:$0xff]  ;;  %v2378_v16 = vld [vmem:[%s2202_s29 + $0x88] sm:$0xff] }
  0x63   : > { %v668_v27 = vrot.slane %v1831_v29, 1  ;;  %v669_v30 = vrot.slane %v1831_v29, 2  ;;  %v670_v31 = vrot.slane %v1831_v29, 3  ;;  %v671_v33 = vrot.slane %v1831_v29, 4 }
  0x64   : > { %v597_v53 = vmax.f32 %v590_v51, %v592_v41  ;;  %v598_v54 = vmax.f32 %v594_v48, %v596_v52  ;;  %v672_v34 = vrot.slane %v1831_v29, 5  ;;  %v674_v18 = vrot.slane %v1831_v29, 7  ;;  %v2384_v51 = vld [vmem:[%s2202_s29 + $0x98] sm:$0xff] }
  0x66   : > { %v2355_v55 = vmax.f32 %v597_v53, %v598_v54  ;;  %v680_v24 = vperm.slane %v672_v34, 0  ;;  %v2391_v54 = vld [vmem:[%s2202_s29 + $0xa0] sm:$0xff] }
  0x68   : > { %v600_v56 = vsub.f32 %v577_v38, %v2355_v55  ;;  %v601_v57 = vsub.f32 %v578_v39, %v2355_v55  ;;  %v602_v59 = vsub.f32 %v579_v40, %v2355_v55  ;;  %v603_v60 = vsub.f32 %v580_v42, %v2355_v55 }
  0x69   : > { %v604_v61 = vsub.f32 %v581_v43, %v2355_v55  ;;  %v605_v62 = vsub.f32 %v582_v44, %v2355_v55  ;;  %v606_v2 = vsub.f32 %v583_v45, %v2355_v55  ;;  %v607_v6 = vsub.f32 %v584_v46, %v2355_v55 }
  0x6a   : > { %v608_v63 = vmul.f32 1.442695, %v600_v56  ;;  %v610_v0 = vmul.f32 1.442695, %v601_v57  ;;  %v612_v1 = vmul.f32 1.442695, %v602_v59 }
  0x6b   : > { %v614_v5 = vmul.f32 1.442695, %v603_v60  ;;  %v616_v7 = vmul.f32 1.442695, %v604_v61  ;;  %v618_v8 = vmul.f32 1.442695, %v605_v62 }
  0x6c   : > { %1969 = vpow2.f32 %v608_v63  ;;  %v620_v14 = vmul.f32 1.442695, %v606_v2  ;;  %v622_v19 = vmul.f32 1.442695, %v607_v6  ;;  %v673_v38 = vrot.slane %v1831_v29, 6 }
  0x6d   : > { %1971 = vpow2.f32 %v610_v0  ;;  %v675_v39 = vperm.slane %v1831_v29, 0  ;;  %v676_v40 = vperm.slane %v668_v27, 0  ;;  %v677_v42 = vperm.slane %v669_v30, 0  ;;  %v491_v63 = vld [vmem:[%s2212_s9 + $0x1] sm:$0x1] }
  0x6e   : > { %1973 = vpow2.f32 %v612_v1  ;;  %v678_v45 = vperm.slane %v670_v31, 0  ;;  %v679_v46 = vperm.slane %v671_v33, 0  ;;  %v681_v56 = vperm.slane %v673_v38, 0  ;;  %v1828_v1 = vld [vmem:[%s2202_s29 + $0xa8] sm:$0xff]  ;;  %v1935_v38 = vld [vmem:[%s2212_s9 + $0x2] ss:$0 sm:$0xff] }
  0x6f   : > { %1975 = vpow2.f32 %v614_v5  ;;  %v691_v41 = vmul.f32 %v2375_v50, %v675_v39  ;;  %v692_v48 = vmul.f32 %v2378_v16, %v676_v40  ;;  %v693_v52 = vmul.f32 %v2381_v17, %v677_v42 }
  0x70   : > { %1977 = vpow2.f32 %v616_v7  ;;  %v694_v57 = vmul.f32 %v2384_v51, %v678_v45  ;;  %v695_v60 = vmul.f32 %v2391_v54, %v679_v46  ;;  %v682_v7 = vperm.slane %v674_v18, 0 }
  0x71   : > { %1979 = vpow2.f32 %v618_v8  ;;  %v699_v61 = vsel %vm366_vm1, %v691_v41, 0.0  ;;  %v700_v62 = vsel %vm366_vm1, %v692_v48, 0.0  ;;  %v702_v5 = vsel %vm366_vm1, %v693_v52, 0.0 }
  0x72   : > { %v1970_v9 = vpop.eup %1969  ;;  %1981 = vpow2.f32 %v620_v14  ;;  %v701_v2 = vadd.f32 %v700_v62, %v699_v61  ;;  %v696_v8 = vmul.f32 %v1828_v1, %v680_v24  ;;  %v704_v14 = vsel %vm366_vm1, %v694_v57, 0.0 }
  0x73   : > { %v1972_v10 = vpop.eup %1971  ;;  %v624_v11 = vsel %vm366_vm1, %v1970_v9, 0.0  ;;  %1983 = vpow2.f32 %v622_v19  ;;  %v1829_v19 = vld [vmem:[%s2202_s29 + $0xb0] sm:$0xff]  ;;  %vm642_vm9 = vcmp.gt.f32.partialorder %v491_v63, 0.5 }
  0x74   : > { %v1974_v15 = vpop.eup %1973  ;;  %v625_v21 = vsel %vm366_vm1, %v1972_v10, 0.0  ;;  %v703_v20 = vadd.f32 %v702_v5, %v701_v2  ;;  %v697_v10 = vmul.f32 %v1829_v19, %v681_v56 }
  0x75   : > { %v1976_v22 = vpop.eup %1975  ;;  %v626_v23 = vadd.f32 %v625_v21, %v624_v11  ;;  %v627_v26 = vsel %vm366_vm1, %v1974_v15, 0.0  ;;  %v706_v11 = vsel %vm366_vm1, %v695_v60, 0.0  ;;  %v1830_v15 = vld [vmem:[%s2202_s29 + $0xb8] sm:$0xff]  ;;  %v1934_v21 = vld [vmem:[%s2207_s6 + $0x2] ss:$0 sm:$0xff] }
  0x76   : > { %v1978_v3 = vpop.eup %1977  ;;  %v629_v28 = vsel %vm366_vm1, %v1976_v22, 0.0  ;;  %v705_v29 = vadd.f32 %v704_v14, %v703_v20  ;;  %v698_v22 = vmul.f32 %v1830_v15, %v682_v7  ;;  %v710_v30 = vsel %vm366_vm1, %v697_v10, 0.0 }
  0x77   : > { %v1980_v35 = vpop.eup %1979  ;;  %v628_v36 = vadd.f32 %v627_v26, %v626_v23  ;;  %v631_v37 = vsel %vm366_vm1, %v1978_v3, 0.0  ;;  %v708_v23 = vsel %vm366_vm1, %v696_v8, 0.0  ;;  %v643_v26 = vsel %vm642_vm9, 1, %v2143_v58 }
  0x78   : > { %v1982_v43 = vpop.eup %1981  ;;  %v633_v49 = vsel %vm366_vm1, %v1980_v35, 0.0  ;;  %v707_v27 = vadd.f32 %v706_v11, %v705_v29  ;;  %vm664_vm10 = vcmp.eq.s32.totalorder %v2218_v4, %v1934_v21  ;;  %v712_v31 = vsel %vm366_vm1, %v698_v22, 0.0 }
  0x79   : > { %v630_v44 = vadd.f32 %v629_v28, %v628_v36  ;;  %v1984_v47 = vpop.eup %1983  ;;  %v635_v53 = vsel %vm366_vm1, %v1982_v43, 0.0  ;;  %v644_v28 = vperm.slane %v643_v26, 0  ;;  %v1832_v35 = vsel %vm664_vm10, 1.0, %v2142_v13 }
  0x7a   : > { %v637_v0 = vsel %vm366_vm1, %v1984_v47, 0.0  ;;  %v709_v3 = vadd.f32 %v708_v23, %v707_v27 }
  0x7b   : > { %v632_v32 = vadd.f32 %v631_v37, %v630_v44  ;;  %vm645_vm11 = vcmp.eq.s32.totalorder %v644_v28, 1 }
  0x7c   : > { %v711_v33 = vadd.f32 %v710_v30, %v709_v3 }
  0x7d   : > { %v634_v59 = vadd.f32 %v633_v49, %v632_v32 }
  0x7e   : > { %v713_v37 = vadd.f32 %v712_v31, %v711_v33 }
  0x7f   : > { %v636_v6 = vadd.f32 %v635_v53, %v634_v59 }
  0x80   : > { %v714_v40 = vmul.f32 %v1832_v35, %v713_v37  ;;  %v1936_v37 = vld [vmem:[%s2197_s26 + $0x3] ss:$0 sm:$0xff] }
  0x81   : > { %v638_v9 = vadd.f32 %v637_v0, %v636_v6  ;;  %vm825_vm12 = vcmp.eq.s32.totalorder %v2218_v4, %v1936_v37 }
  0x82   : > { %v716_v43 = vmul.f32 %v1935_v38, %v714_v40 }
  0x83   : > { %1985 = vlog2.f32 %v638_v9 }
  0x84   : > { %v2422_v49 = vadd.f32 %v716_v43, %v2335_v25 }
  0x89   : > { %v1986_v34 = vpop.eup %1985 }
  0x8a   : > { %v640_v36 = vmul.f32 0.6931472, %v1986_v34 }
  0x8c   : > { %v641_v39 = vadd.f32 %v640_v36, %v2355_v55 }
  0x8e   : > { %v2415_v42 = vsel %vm645_vm11, %v641_v39, %v2329_v12 }
  0x8f   : > { %v719_v44 = vrot.slane %v2415_v42, 1  ;;  %v720_v45 = vrot.slane %v2415_v42, 2  ;;  %v721_v46 = vrot.slane %v2415_v42, 3  ;;  %v722_v47 = vrot.slane %v2415_v42, 4 }
  0x90   : > { %v723_v18 = vrot.slane %v2415_v42, 5  ;;  %v724_v55 = vrot.slane %v2415_v42, 6  ;;  %v725_v24 = vrot.slane %v2415_v42, 7  ;;  %v726_v12 = vperm.slane %v2415_v42, 0 }
  0x91   : > { %v727_v32 = vperm.slane %v719_v44, 0  ;;  %v728_v41 = vperm.slane %v720_v45, 0  ;;  %v729_v48 = vperm.slane %v721_v46, 0  ;;  %v730_v52 = vperm.slane %v722_v47, 0 }
  0x92   : > { %v731_v53 = vperm.slane %v723_v18, 0  ;;  %v732_v56 = vperm.slane %v724_v55, 0  ;;  %v733_v57 = vperm.slane %v725_v24, 0  ;;  %v742_v59 = vadd.f32 %v2375_v50, %v726_v12 }
  0x93   : > { %v743_v25 = vadd.f32 %v2378_v16, %v727_v32  ;;  %v744_v60 = vadd.f32 %v2381_v17, %v728_v41  ;;  %v745_v61 = vadd.f32 %v2384_v51, %v729_v48  ;;  %v746_v62 = vadd.f32 %v2391_v54, %v730_v52 }
  0x94   : > { %v747_v63 = vadd.f32 %v1828_v1, %v731_v53  ;;  %v748_v0 = vadd.f32 %v1829_v19, %v732_v56  ;;  %v749_v2 = vadd.f32 %v1830_v15, %v733_v57  ;;  %v750_v5 = vsel %vm366_vm1, %v742_v59, -inf }
  0x95   : > { %v751_v6 = vsel %vm366_vm1, %v743_v25, -inf  ;;  %v752_v7 = vsel %vm366_vm1, %v744_v60, -inf  ;;  %v753_v8 = vsel %vm366_vm1, %v745_v61, -inf  ;;  %v754_v50 = vsel %vm366_vm1, %v746_v62, -inf }
  0x96   : > { %v756_v16 = vsel %vm366_vm1, %v747_v63, -inf  ;;  %v758_v17 = vsel %vm366_vm1, %v748_v0, -inf  ;;  %v760_v51 = vsel %vm366_vm1, %v749_v2, -inf  ;;  %v755_v54 = vmax.f32 %v750_v5, %v754_v50  ;;  %v2467_v50 = vld [vmem:[%s2202_s29 + $0xd0] sm:$0xff] }
  0x97   : > { %v757_v1 = vmax.f32 %v751_v6, %v756_v16  ;;  %v759_v14 = vmax.f32 %v752_v7, %v758_v17  ;;  %v761_v19 = vmax.f32 %v753_v8, %v760_v51  ;;  %v1841_v45 = vsel %vm825_vm12, 1.0, %v2142_v13  ;;  %v2461_v7 = vld [vmem:[%s2202_s29 + $0xc0] sm:$0xff]  ;;  %v2464_v8 = vld [vmem:[%s2202_s29 + $0xc8] sm:$0xff] }
  0x98   : > { %v833_v55 = vrot.slane %v1841_v45, 1  ;;  %v834_v24 = vrot.slane %v1841_v45, 2  ;;  %v835_v41 = vrot.slane %v1841_v45, 3  ;;  %v836_v48 = vrot.slane %v1841_v45, 4 }
  0x99   : > { %v762_v20 = vmax.f32 %v755_v54, %v757_v1  ;;  %v763_v9 = vmax.f32 %v759_v14, %v761_v19  ;;  %v837_v52 = vrot.slane %v1841_v45, 5  ;;  %v839_v16 = vrot.slane %v1841_v45, 7  ;;  %v2470_v54 = vld [vmem:[%s2202_s29 + $0xd8] sm:$0xff] }
  0x9b   : > { %v2441_v10 = vmax.f32 %v762_v20, %v763_v9  ;;  %v845_v17 = vperm.slane %v837_v52, 0  ;;  %v2477_v9 = vld [vmem:[%s2202_s29 + $0xe0] sm:$0xff] }
  0x9d   : > { %v765_v11 = vsub.f32 %v742_v59, %v2441_v10  ;;  %v766_v15 = vsub.f32 %v743_v25, %v2441_v10  ;;  %v767_v21 = vsub.f32 %v744_v60, %v2441_v10  ;;  %v768_v29 = vsub.f32 %v745_v61, %v2441_v10 }
  0x9e   : > { %v769_v22 = vsub.f32 %v746_v62, %v2441_v10  ;;  %v770_v23 = vsub.f32 %v747_v63, %v2441_v10  ;;  %v771_v3 = vsub.f32 %v748_v0, %v2441_v10  ;;  %v772_v31 = vsub.f32 %v749_v2, %v2441_v10 }
  0x9f   : > { %v773_v26 = vmul.f32 1.442695, %v765_v11  ;;  %v775_v27 = vmul.f32 1.442695, %v766_v15  ;;  %v777_v30 = vmul.f32 1.442695, %v767_v21 }
  0xa0   : > { %v779_v28 = vmul.f32 1.442695, %v768_v29  ;;  %v781_v33 = vmul.f32 1.442695, %v769_v22  ;;  %v783_v34 = vmul.f32 1.442695, %v770_v23 }
  0xa1   : > { %1987 = vpow2.f32 %v773_v26  ;;  %v785_v35 = vmul.f32 1.442695, %v771_v3  ;;  %v787_v36 = vmul.f32 1.442695, %v772_v31  ;;  %v838_v59 = vrot.slane %v1841_v45, 6 }
  0xa2   : > { %1989 = vpow2.f32 %v775_v27  ;;  %v840_v25 = vperm.slane %v1841_v45, 0  ;;  %v841_v60 = vperm.slane %v833_v55, 0  ;;  %v842_v61 = vperm.slane %v834_v24, 0  ;;  %v656_v26 = vld [vmem:[%s2212_s9 + $0x2] sm:$0x1] }
  0xa3   : > { %1991 = vpow2.f32 %v777_v30  ;;  %v843_v0 = vperm.slane %v835_v41, 0  ;;  %v844_v2 = vperm.slane %v836_v48, 0  ;;  %v846_v11 = vperm.slane %v838_v59, 0  ;;  %v1838_v30 = vld [vmem:[%s2202_s29 + $0xe8] sm:$0xff]  ;;  %v1938_v59 = vld [vmem:[%s2212_s9 + $0x3] ss:$0 sm:$0xff] }
  0xa4   : > { %1993 = vpow2.f32 %v779_v28  ;;  %v856_v1 = vmul.f32 %v2461_v7, %v840_v25  ;;  %v857_v14 = vmul.f32 %v2464_v8, %v841_v60  ;;  %v858_v19 = vmul.f32 %v2467_v50, %v842_v61 }
  0xa5   : > { %1995 = vpow2.f32 %v781_v33  ;;  %v859_v15 = vmul.f32 %v2470_v54, %v843_v0  ;;  %v860_v29 = vmul.f32 %v2477_v9, %v844_v2  ;;  %v847_v33 = vperm.slane %v839_v16, 0 }
  0xa6   : > { %1997 = vpow2.f32 %v783_v34  ;;  %v864_v22 = vsel %vm366_vm1, %v856_v1, 0.0  ;;  %v865_v23 = vsel %vm366_vm1, %v857_v14, 0.0  ;;  %v867_v28 = vsel %vm366_vm1, %v858_v19, 0.0 }
  0xa7   : > { %v1988_v38 = vpop.eup %1987  ;;  %1999 = vpow2.f32 %v785_v35  ;;  %v866_v3 = vadd.f32 %v865_v23, %v864_v22  ;;  %v861_v34 = vmul.f32 %v1838_v30, %v845_v17  ;;  %v869_v35 = vsel %vm366_vm1, %v859_v15, 0.0 }
  0xa8   : > { %v1990_v39 = vpop.eup %1989  ;;  %v789_v40 = vsel %vm366_vm1, %v1988_v38, 0.0  ;;  %2001 = vpow2.f32 %v787_v36  ;;  %v1839_v36 = vld [vmem:[%s2202_s29 + $0xf0] sm:$0xff]  ;;  %vm807_vm13 = vcmp.gt.f32.partialorder %v656_v26, 0.5 }
  0xa9   : > { %v1992_v43 = vpop.eup %1991  ;;  %v790_v44 = vsel %vm366_vm1, %v1990_v39, 0.0  ;;  %v868_v37 = vadd.f32 %v867_v28, %v866_v3  ;;  %v862_v39 = vmul.f32 %v1839_v36, %v846_v11 }
  0xaa   : > { %v1994_v46 = vpop.eup %1993  ;;  %v791_v47 = vadd.f32 %v790_v44, %v789_v40  ;;  %v792_v18 = vsel %vm366_vm1, %v1992_v43, 0.0  ;;  %v871_v40 = vsel %vm366_vm1, %v860_v29, 0.0  ;;  %v1840_v43 = vld [vmem:[%s2202_s29 + $0xf8] sm:$0xff]  ;;  %v1937_v44 = vld [vmem:[%s2207_s6 + $0x3] ss:$0 sm:$0xff] }
  0xab   : > { %v1996_v12 = vpop.eup %1995  ;;  %v794_v32 = vsel %vm366_vm1, %v1994_v46, 0.0  ;;  %v870_v45 = vadd.f32 %v869_v35, %v868_v37  ;;  %v863_v46 = vmul.f32 %v1840_v43, %v847_v33  ;;  %v875_v24 = vsel %vm366_vm1, %v862_v39, 0.0 }
  0xac   : > { %v1998_v53 = vpop.eup %1997  ;;  %v793_v56 = vadd.f32 %v792_v18, %v791_v47  ;;  %v796_v57 = vsel %vm366_vm1, %v1996_v12, 0.0  ;;  %v873_v47 = vsel %vm366_vm1, %v861_v34, 0.0  ;;  %v808_v18 = vsel %vm807_vm13, 1, %v2143_v58 }
  0xad   : > { %v2000_v62 = vpop.eup %1999  ;;  %v798_v6 = vsel %vm366_vm1, %v1998_v53, 0.0  ;;  %v872_v55 = vadd.f32 %v871_v40, %v870_v45  ;;  %vm829_vm14 = vcmp.eq.s32.totalorder %v2218_v4, %v1937_v44  ;;  %v877_v41 = vsel %vm366_vm1, %v863_v46, 0.0 }
  0xae   : > { %v795_v63 = vadd.f32 %v794_v32, %v793_v56  ;;  %v2002_v5 = vpop.eup %2001  ;;  %v800_v20 = vsel %vm366_vm1, %v2000_v62, 0.0  ;;  %v809_v32 = vperm.slane %v808_v18, 0  ;;  %v1842_v53 = vsel %vm829_vm14, 1.0, %v2142_v13 }
  0xaf   : > { %v802_v27 = vsel %vm366_vm1, %v2002_v5, 0.0  ;;  %v874_v12 = vadd.f32 %v873_v47, %v872_v55 }
  0xb0   : > { %v797_v51 = vadd.f32 %v796_v57, %v795_v63  ;;  %vm810_vm15 = vcmp.eq.s32.totalorder %v809_v32, 1 }
  0xb1   : > { %v876_v48 = vadd.f32 %v875_v24, %v874_v12 }
  0xb2   : > { %v799_v21 = vadd.f32 %v798_v6, %v797_v51 }
  0xb3   : > { %v878_v57 = vadd.f32 %v877_v41, %v876_v48 }
  0xb4   : > { %v801_v31 = vadd.f32 %v800_v20, %v799_v21 }
  0xb5   : > { %v879_v60 = vmul.f32 %v1842_v53, %v878_v57  ;;  %v1939_v57 = vld [vmem:[%s2197_s26 + $0x4] ss:$0 sm:$0xff] }
  0xb6   : > { %v803_v38 = vadd.f32 %v802_v27, %v801_v31  ;;  %vm990_vm0 = vcmp.eq.s32.totalorder %v2218_v4, %v1939_v57 }
  0xb7   : > { %v881_v62 = vmul.f32 %v1938_v59, %v879_v60 }
  0xb8   : > { %2003 = vlog2.f32 %v803_v38 }
  0xb9   : > { %v2508_v6 = vadd.f32 %v881_v62, %v2422_v49 }
  0xbe   : > { %v2004_v52 = vpop.eup %2003 }
  0xbf   : > { %v805_v56 = vmul.f32 0.6931472, %v2004_v52 }
  0xc1   : > { %v806_v25 = vadd.f32 %v805_v56, %v2441_v10 }
  0xc3   : > { %v2501_v61 = vsel %vm810_vm15, %v806_v25, %v2415_v42 }
  0xc4   : > { %v884_v63 = vrot.slane %v2501_v61, 1  ;;  %v885_v0 = vrot.slane %v2501_v61, 2  ;;  %v886_v2 = vrot.slane %v2501_v61, 3  ;;  %v887_v5 = vrot.slane %v2501_v61, 4 }
  0xc5   : > { %v888_v16 = vrot.slane %v2501_v61, 5  ;;  %v889_v10 = vrot.slane %v2501_v61, 6  ;;  %v890_v17 = vrot.slane %v2501_v61, 7  ;;  %v891_v42 = vperm.slane %v2501_v61, 0 }
  0xc6   : > { %v892_v51 = vperm.slane %v884_v63, 0  ;;  %v893_v1 = vperm.slane %v885_v0, 0  ;;  %v894_v14 = vperm.slane %v886_v2, 0  ;;  %v895_v19 = vperm.slane %v887_v5, 0 }
  0xc7   : > { %v896_v20 = vperm.slane %v888_v16, 0  ;;  %v897_v11 = vperm.slane %v889_v10, 0  ;;  %v898_v15 = vperm.slane %v890_v17, 0  ;;  %v907_v21 = vadd.f32 %v2461_v7, %v891_v42 }
  0xc8   : > { %v908_v49 = vadd.f32 %v2464_v8, %v892_v51  ;;  %v909_v29 = vadd.f32 %v2467_v50, %v893_v1  ;;  %v910_v22 = vadd.f32 %v2470_v54, %v894_v14  ;;  %v911_v23 = vadd.f32 %v2477_v9, %v895_v19 }
  0xc9   : > { %v912_v26 = vadd.f32 %v1838_v30, %v896_v20  ;;  %v913_v27 = vadd.f32 %v1839_v36, %v897_v11  ;;  %v914_v3 = vadd.f32 %v1840_v43, %v898_v15  ;;  %v915_v28 = vsel %vm366_vm1, %v907_v21, -inf }
  0xca   : > { %v916_v31 = vsel %vm366_vm1, %v908_v49, -inf  ;;  %v917_v33 = vsel %vm366_vm1, %v909_v29, -inf  ;;  %v918_v34 = vsel %vm366_vm1, %v910_v22, -inf  ;;  %v919_v7 = vsel %vm366_vm1, %v911_v23, -inf }
  0xcb   : > { %v921_v8 = vsel %vm366_vm1, %v912_v26, -inf  ;;  %v923_v50 = vsel %vm366_vm1, %v913_v27, -inf  ;;  %v925_v54 = vsel %vm366_vm1, %v914_v3, -inf  ;;  %v920_v9 = vmax.f32 %v915_v28, %v919_v7  ;;  %v2553_v7 = vld [vmem:[%s2202_s29 + $0x110] sm:$0xff] }
  0xcc   : > { %v922_v30 = vmax.f32 %v916_v31, %v921_v8  ;;  %v924_v35 = vmax.f32 %v917_v33, %v923_v50  ;;  %v926_v36 = vmax.f32 %v918_v34, %v925_v54  ;;  %v1851_v0 = vsel %vm990_vm0, 1.0, %v2142_v13  ;;  %v2547_v33 = vld [vmem:[%s2202_s29 + $0x100] sm:$0xff]  ;;  %v2550_v34 = vld [vmem:[%s2202_s29 + $0x108] sm:$0xff] }
  0xcd   : > { %v998_v10 = vrot.slane %v1851_v0, 1  ;;  %v999_v17 = vrot.slane %v1851_v0, 2  ;;  %v1000_v1 = vrot.slane %v1851_v0, 3  ;;  %v1001_v14 = vrot.slane %v1851_v0, 4 }
  0xce   : > { %v927_v37 = vmax.f32 %v920_v9, %v922_v30  ;;  %v928_v38 = vmax.f32 %v924_v35, %v926_v36  ;;  %v1002_v19 = vrot.slane %v1851_v0, 5  ;;  %v1004_v8 = vrot.slane %v1851_v0, 7  ;;  %v2556_v9 = vld [vmem:[%s2202_s29 + $0x118] sm:$0xff] }
  0xd0   : > { %v2527_v39 = vmax.f32 %v927_v37, %v928_v38  ;;  %v1010_v50 = vperm.slane %v1002_v19, 0  ;;  %v2563_v38 = vld [vmem:[%s2202_s29 + $0x120] sm:$0xff] }
  0xd2   : > { %v930_v40 = vsub.f32 %v907_v21, %v2527_v39  ;;  %v931_v43 = vsub.f32 %v908_v49, %v2527_v39  ;;  %v932_v44 = vsub.f32 %v909_v29, %v2527_v39  ;;  %v933_v45 = vsub.f32 %v910_v22, %v2527_v39 }
  0xd3   : > { %v934_v46 = vsub.f32 %v911_v23, %v2527_v39  ;;  %v935_v47 = vsub.f32 %v912_v26, %v2527_v39  ;;  %v936_v12 = vsub.f32 %v913_v27, %v2527_v39  ;;  %v937_v41 = vsub.f32 %v914_v3, %v2527_v39 }
  0xd4   : > { %v938_v18 = vmul.f32 1.442695, %v930_v40  ;;  %v940_v55 = vmul.f32 1.442695, %v931_v43  ;;  %v942_v24 = vmul.f32 1.442695, %v932_v44 }
  0xd5   : > { %v944_v32 = vmul.f32 1.442695, %v933_v45  ;;  %v946_v48 = vmul.f32 1.442695, %v934_v46  ;;  %v948_v52 = vmul.f32 1.442695, %v935_v47 }
  0xd6   : > { %2005 = vpow2.f32 %v938_v18  ;;  %v950_v53 = vmul.f32 1.442695, %v936_v12  ;;  %v952_v56 = vmul.f32 1.442695, %v937_v41  ;;  %v1003_v21 = vrot.slane %v1851_v0, 6 }
  0xd7   : > { %2007 = vpow2.f32 %v940_v55  ;;  %v1005_v49 = vperm.slane %v1851_v0, 0  ;;  %v1006_v29 = vperm.slane %v998_v10, 0  ;;  %v1007_v22 = vperm.slane %v999_v17, 0  ;;  %v821_v18 = vld [vmem:[%s2212_s9 + $0x3] sm:$0x1] }
  0xd8   : > { %2009 = vpow2.f32 %v942_v24  ;;  %v1008_v27 = vperm.slane %v1000_v1, 0  ;;  %v1009_v3 = vperm.slane %v1001_v14, 0  ;;  %v1011_v40 = vperm.slane %v1003_v21, 0  ;;  %v1848_v24 = vld [vmem:[%s2202_s29 + $0x128] sm:$0xff]  ;;  %v1941_v21 = vld [vmem:[%s2212_s9 + $0x4] ss:$0 sm:$0xff] }
  0xd9   : > { %2011 = vpow2.f32 %v944_v32  ;;  %v1021_v30 = vmul.f32 %v2547_v33, %v1005_v49  ;;  %v1022_v35 = vmul.f32 %v2550_v34, %v1006_v29  ;;  %v1023_v36 = vmul.f32 %v2553_v7, %v1007_v22 }
  0xda   : > { %2013 = vpow2.f32 %v946_v48  ;;  %v1024_v43 = vmul.f32 %v2556_v9, %v1008_v27  ;;  %v1025_v45 = vmul.f32 %v2563_v38, %v1009_v3  ;;  %v1012_v48 = vperm.slane %v1004_v8, 0 }
  0xdb   : > { %2015 = vpow2.f32 %v948_v52  ;;  %v1029_v46 = vsel %vm366_vm1, %v1021_v30, 0.0  ;;  %v1030_v47 = vsel %vm366_vm1, %v1022_v35, 0.0  ;;  %v1032_v32 = vsel %vm366_vm1, %v1023_v36, 0.0 }
  0xdc   : > { %v2006_v59 = vpop.eup %2005  ;;  %2017 = vpow2.f32 %v950_v53  ;;  %v1031_v12 = vadd.f32 %v1030_v47, %v1029_v46  ;;  %v1026_v52 = vmul.f32 %v1848_v24, %v1010_v50  ;;  %v1034_v53 = vsel %vm366_vm1, %v1024_v43, 0.0 }
  0xdd   : > { %v2008_v25 = vpop.eup %2007  ;;  %v954_v60 = vsel %vm366_vm1, %v2006_v59, 0.0  ;;  %2019 = vpow2.f32 %v952_v56  ;;  %v1849_v56 = vld [vmem:[%s2202_s29 + $0x130] sm:$0xff]  ;;  %vm972_vm2 = vcmp.gt.f32.partialorder %v821_v18, 0.5 }
  0xde   : > { %v2010_v62 = vpop.eup %2009  ;;  %v955_v63 = vsel %vm366_vm1, %v2008_v25, 0.0  ;;  %v1033_v57 = vadd.f32 %v1032_v32, %v1031_v12  ;;  %v1027_v25 = vmul.f32 %v1849_v56, %v1011_v40 }
  0xdf   : > { %v2012_v2 = vpop.eup %2011  ;;  %v956_v5 = vadd.f32 %v955_v63, %v954_v60  ;;  %v957_v16 = vsel %vm366_vm1, %v2010_v62, 0.0  ;;  %v1036_v60 = vsel %vm366_vm1, %v1025_v45, 0.0  ;;  %v1850_v62 = vld [vmem:[%s2202_s29 + $0x138] sm:$0xff]  ;;  %v1940_v63 = vld [vmem:[%s2207_s6 + $0x4] ss:$0 sm:$0xff] }
  0xe0   : > { %v2014_v42 = vpop.eup %2013  ;;  %v959_v51 = vsel %vm366_vm1, %v2012_v2, 0.0  ;;  %v1035_v0 = vadd.f32 %v1034_v53, %v1033_v57  ;;  %v1028_v2 = vmul.f32 %v1850_v62, %v1012_v48  ;;  %v1040_v17 = vsel %vm366_vm1, %v1027_v25, 0.0 }
  0xe1   : > { %v2016_v20 = vpop.eup %2015  ;;  %v958_v11 = vadd.f32 %v957_v16, %v956_v5  ;;  %v961_v15 = vsel %vm366_vm1, %v2014_v42, 0.0  ;;  %v1038_v5 = vsel %vm366_vm1, %v1026_v52, 0.0  ;;  %v973_v16 = vsel %vm972_vm2, 1, %v2143_v58 }
  0xe2   : > { %v2018_v23 = vpop.eup %2017  ;;  %v963_v31 = vsel %vm366_vm1, %v2016_v20, 0.0  ;;  %v1037_v10 = vadd.f32 %v1036_v60, %v1035_v0  ;;  %vm994_vm3 = vcmp.eq.s32.totalorder %v2218_v4, %v1940_v63  ;;  %v1042_v1 = vsel %vm366_vm1, %v1028_v2, 0.0 }
  0xe3   : > { %v960_v26 = vadd.f32 %v959_v51, %v958_v11  ;;  %v2020_v28 = vpop.eup %2019  ;;  %v965_v37 = vsel %vm366_vm1, %v2018_v23, 0.0  ;;  %v974_v51 = vperm.slane %v973_v16, 0  ;;  %v1852_v20 = vsel %vm994_vm3, 1.0, %v2142_v13 }
  0xe4   : > { %v967_v55 = vsel %vm366_vm1, %v2020_v28, 0.0  ;;  %v1039_v42 = vadd.f32 %v1038_v5, %v1037_v10 }
  0xe5   : > { %v962_v54 = vadd.f32 %v961_v15, %v960_v26  ;;  %vm975_vm4 = vcmp.eq.s32.totalorder %v974_v51, 1 }
  0xe6   : > { %v1041_v14 = vadd.f32 %v1040_v17, %v1039_v42 }
  0xe7   : > { %v964_v44 = vadd.f32 %v963_v31, %v962_v54 }
  0xe8   : > { %v1043_v15 = vadd.f32 %v1042_v1, %v1041_v14 }
  0xe9   : > { %v966_v41 = vadd.f32 %v965_v37, %v964_v44 }
  0xea   : > { %v1044_v29 = vmul.f32 %v1852_v20, %v1043_v15  ;;  %v1942_v15 = vld [vmem:[%s2197_s26 + $0x5] ss:$0 sm:$0xff] }
  0xeb   : > { %v968_v59 = vadd.f32 %v967_v55, %v966_v41  ;;  %vm1155_vm5 = vcmp.eq.s32.totalorder %v2218_v4, %v1942_v15 }
  0xec   : > { %v1046_v23 = vmul.f32 %v1941_v21, %v1044_v29 }
  0xed   : > { %2021 = vlog2.f32 %v968_v59 }
  0xee   : > { %v2594_v31 = vadd.f32 %v1046_v23, %v2508_v6 }
  0xf3   : > { %v2022_v19 = vpop.eup %2021 }
  0xf4   : > { %v970_v11 = vmul.f32 0.6931472, %v2022_v19 }
  0xf6   : > { %v971_v49 = vadd.f32 %v970_v11, %v2527_v39 }
  0xf8   : > { %v2587_v22 = vsel %vm975_vm4, %v971_v49, %v2501_v61 }
  0xf9   : > { %v1049_v26 = vrot.slane %v2587_v22, 1  ;;  %v1050_v27 = vrot.slane %v2587_v22, 2  ;;  %v1051_v3 = vrot.slane %v2587_v22, 3  ;;  %v1052_v28 = vrot.slane %v2587_v22, 4 }
  0xfa   : > { %v1053_v8 = vrot.slane %v2587_v22, 5  ;;  %v1054_v39 = vrot.slane %v2587_v22, 6  ;;  %v1055_v50 = vrot.slane %v2587_v22, 7  ;;  %v1056_v61 = vperm.slane %v2587_v22, 0 }
  0xfb   : > { %v1057_v54 = vperm.slane %v1049_v26, 0  ;;  %v1058_v30 = vperm.slane %v1050_v27, 0  ;;  %v1059_v35 = vperm.slane %v1051_v3, 0  ;;  %v1060_v36 = vperm.slane %v1052_v28, 0 }
  0xfc   : > { %v1061_v37 = vperm.slane %v1053_v8, 0  ;;  %v1062_v40 = vperm.slane %v1054_v39, 0  ;;  %v1063_v43 = vperm.slane %v1055_v50, 0  ;;  %v1072_v44 = vadd.f32 %v2547_v33, %v1056_v61 }
  0xfd   : > { %v1073_v6 = vadd.f32 %v2550_v34, %v1057_v54  ;;  %v1074_v45 = vadd.f32 %v2553_v7, %v1058_v30  ;;  %v1075_v46 = vadd.f32 %v2556_v9, %v1059_v35  ;;  %v1076_v47 = vadd.f32 %v2563_v38, %v1060_v36 }
  0xfe   : > { %v1077_v18 = vadd.f32 %v1848_v24, %v1061_v37  ;;  %v1078_v55 = vadd.f32 %v1849_v56, %v1062_v40  ;;  %v1079_v12 = vadd.f32 %v1850_v62, %v1063_v43  ;;  %v1080_v32 = vsel %vm366_vm1, %v1072_v44, -inf }
  0xff   : > { %v1081_v41 = vsel %vm366_vm1, %v1073_v6, -inf  ;;  %v1082_v48 = vsel %vm366_vm1, %v1074_v45, -inf  ;;  %v1083_v52 = vsel %vm366_vm1, %v1075_v46, -inf  ;;  %v1084_v33 = vsel %vm366_vm1, %v1076_v47, -inf }
 0x100   : > { %v1086_v34 = vsel %vm366_vm1, %v1077_v18, -inf  ;;  %v1088_v7 = vsel %vm366_vm1, %v1078_v55, -inf  ;;  %v1090_v9 = vsel %vm366_vm1, %v1079_v12, -inf  ;;  %v1085_v38 = vmax.f32 %v1080_v32, %v1084_v33  ;;  %v2639_v33 = vld [vmem:[%s2202_s29 + $0x150] sm:$0xff] }
 0x101   : > { %v1087_v24 = vmax.f32 %v1081_v41, %v1086_v34  ;;  %v1089_v53 = vmax.f32 %v1082_v48, %v1088_v7  ;;  %v1091_v56 = vmax.f32 %v1083_v52, %v1090_v9  ;;  %v1861_v27 = vsel %vm1155_vm5, 1.0, %v2142_v13  ;;  %v2633_v48 = vld [vmem:[%s2202_s29 + $0x140] sm:$0xff]  ;;  %v2636_v52 = vld [vmem:[%s2202_s29 + $0x148] sm:$0xff] }
 0x102   : > { %v1163_v39 = vrot.slane %v1861_v27, 1  ;;  %v1164_v50 = vrot.slane %v1861_v27, 2  ;;  %v1165_v30 = vrot.slane %v1861_v27, 3  ;;  %v1166_v35 = vrot.slane %v1861_v27, 4 }
 0x103   : > { %v1092_v57 = vmax.f32 %v1085_v38, %v1087_v24  ;;  %v1093_v59 = vmax.f32 %v1089_v53, %v1091_v56  ;;  %v1167_v36 = vrot.slane %v1861_v27, 5  ;;  %v1169_v34 = vrot.slane %v1861_v27, 7  ;;  %v2642_v38 = vld [vmem:[%s2202_s29 + $0x158] sm:$0xff] }
 0x105   : > { %v2613_v25 = vmax.f32 %v1092_v57, %v1093_v59  ;;  %v1175_v7 = vperm.slane %v1167_v36, 0  ;;  %v2649_v59 = vld [vmem:[%s2202_s29 + $0x160] sm:$0xff] }
 0x107   : > { %v1095_v60 = vsub.f32 %v1072_v44, %v2613_v25  ;;  %v1096_v62 = vsub.f32 %v1073_v6, %v2613_v25  ;;  %v1097_v63 = vsub.f32 %v1074_v45, %v2613_v25  ;;  %v1098_v0 = vsub.f32 %v1075_v46, %v2613_v25 }
 0x108   : > { %v1099_v2 = vsub.f32 %v1076_v47, %v2613_v25  ;;  %v1100_v5 = vsub.f32 %v1077_v18, %v2613_v25  ;;  %v1101_v42 = vsub.f32 %v1078_v55, %v2613_v25  ;;  %v1102_v1 = vsub.f32 %v1079_v12, %v2613_v25 }
 0x109   : > { %v1103_v16 = vmul.f32 1.442695, %v1095_v60  ;;  %v1105_v10 = vmul.f32 1.442695, %v1096_v62  ;;  %v1107_v17 = vmul.f32 1.442695, %v1097_v63 }
 0x10a   : > { %v1109_v51 = vmul.f32 1.442695, %v1098_v0  ;;  %v1111_v14 = vmul.f32 1.442695, %v1099_v2  ;;  %v1113_v19 = vmul.f32 1.442695, %v1100_v5 }
 0x10b   : > { %2023 = vpow2.f32 %v1103_v16  ;;  %v1115_v20 = vmul.f32 1.442695, %v1101_v42  ;;  %v1117_v11 = vmul.f32 1.442695, %v1102_v1  ;;  %v1168_v44 = vrot.slane %v1861_v27, 6 }
 0x10c   : > { %2025 = vpow2.f32 %v1105_v10  ;;  %v1170_v6 = vperm.slane %v1861_v27, 0  ;;  %v1171_v45 = vperm.slane %v1163_v39, 0  ;;  %v1172_v46 = vperm.slane %v1164_v50, 0  ;;  %v986_v16 = vld [vmem:[%s2212_s9 + $0x4] sm:$0x1] }
 0x10d   : > { %2027 = vpow2.f32 %v1107_v17  ;;  %v1173_v55 = vperm.slane %v1165_v30, 0  ;;  %v1174_v12 = vperm.slane %v1166_v35, 0  ;;  %v1176_v60 = vperm.slane %v1168_v44, 0  ;;  %v1858_v17 = vld [vmem:[%s2202_s29 + $0x168] sm:$0xff]  ;;  %v1944_v44 = vld [vmem:[%s2212_s9 + $0x5] ss:$0 sm:$0xff] }
 0x10e   : > { %2029 = vpow2.f32 %v1109_v51  ;;  %v1186_v24 = vmul.f32 %v2633_v48, %v1170_v6  ;;  %v1187_v53 = vmul.f32 %v2636_v52, %v1171_v45  ;;  %v1188_v56 = vmul.f32 %v2639_v33, %v1172_v46 }
 0x10f   : > { %2031 = vpow2.f32 %v1111_v14  ;;  %v1189_v62 = vmul.f32 %v2642_v38, %v1173_v55  ;;  %v1190_v0 = vmul.f32 %v2649_v59, %v1174_v12  ;;  %v1177_v14 = vperm.slane %v1169_v34, 0 }
 0x110   : > { %2033 = vpow2.f32 %v1113_v19  ;;  %v1194_v2 = vsel %vm366_vm1, %v1186_v24, 0.0  ;;  %v1195_v5 = vsel %vm366_vm1, %v1187_v53, 0.0  ;;  %v1197_v51 = vsel %vm366_vm1, %v1188_v56, 0.0 }
 0x111   : > { %v2024_v21 = vpop.eup %2023  ;;  %2035 = vpow2.f32 %v1115_v20  ;;  %v1196_v42 = vadd.f32 %v1195_v5, %v1194_v2  ;;  %v1191_v19 = vmul.f32 %v1858_v17, %v1175_v7  ;;  %v1199_v20 = vsel %vm366_vm1, %v1189_v62, 0.0 }
 0x112   : > { %v2026_v49 = vpop.eup %2025  ;;  %v1119_v29 = vsel %vm366_vm1, %v2024_v21, 0.0  ;;  %2037 = vpow2.f32 %v1117_v11  ;;  %v1859_v11 = vld [vmem:[%s2202_s29 + $0x170] sm:$0xff]  ;;  %vm1137_vm6 = vcmp.gt.f32.partialorder %v986_v16, 0.5 }
 0x113   : > { %v2028_v23 = vpop.eup %2027  ;;  %v1120_v26 = vsel %vm366_vm1, %v2026_v49, 0.0  ;;  %v1198_v15 = vadd.f32 %v1197_v51, %v1196_v42  ;;  %v1192_v49 = vmul.f32 %v1859_v11, %v1176_v60 }
 0x114   : > { %v2030_v3 = vpop.eup %2029  ;;  %v1121_v28 = vadd.f32 %v1120_v26, %v1119_v29  ;;  %v1122_v8 = vsel %vm366_vm1, %v2028_v23, 0.0  ;;  %v1201_v29 = vsel %vm366_vm1, %v1190_v0, 0.0  ;;  %v1860_v23 = vld [vmem:[%s2202_s29 + $0x178] sm:$0xff]  ;;  %v1943_v26 = vld [vmem:[%s2207_s6 + $0x5] ss:$0 sm:$0xff] }
 0x115   : > { %v2032_v61 = vpop.eup %2031  ;;  %v1124_v54 = vsel %vm366_vm1, %v2030_v3, 0.0  ;;  %v1200_v27 = vadd.f32 %v1199_v20, %v1198_v15  ;;  %v1193_v3 = vmul.f32 %v1860_v23, %v1177_v14  ;;  %v1205_v50 = vsel %vm366_vm1, %v1192_v49, 0.0 }
 0x116   : > { %v2034_v37 = vpop.eup %2033  ;;  %v1123_v40 = vadd.f32 %v1122_v8, %v1121_v28  ;;  %v1126_v43 = vsel %vm366_vm1, %v2032_v61, 0.0  ;;  %v1203_v28 = vsel %vm366_vm1, %v1191_v19, 0.0  ;;  %v1138_v8 = vsel %vm1137_vm6, 1, %v2143_v58 }
 0x117   : > { %v2036_v47 = vpop.eup %2035  ;;  %v1128_v41 = vsel %vm366_vm1, %v2034_v37, 0.0  ;;  %v1202_v39 = vadd.f32 %v1201_v29, %v1200_v27  ;;  %vm1159_vm7 = vcmp.eq.s32.totalorder %v2218_v4, %v1943_v26  ;;  %v1207_v30 = vsel %vm366_vm1, %v1193_v3, 0.0 }
 0x118   : > { %v1125_v18 = vadd.f32 %v1124_v54, %v1123_v40  ;;  %v2038_v32 = vpop.eup %2037  ;;  %v1130_v57 = vsel %vm366_vm1, %v2036_v47, 0.0  ;;  %v1139_v54 = vperm.slane %v1138_v8, 0  ;;  %v1862_v37 = vsel %vm1159_vm7, 1.0, %v2142_v13 }
 0x119   : > { %v1132_v10 = vsel %vm366_vm1, %v2038_v32, 0.0  ;;  %v1204_v61 = vadd.f32 %v1203_v28, %v1202_v39 }
 0x11a   : > { %v1127_v9 = vadd.f32 %v1126_v43, %v1125_v18  ;;  %vm1140_vm8 = vcmp.eq.s32.totalorder %v1139_v54, 1 }
 0x11b   : > { %v1206_v35 = vadd.f32 %v1205_v50, %v1204_v61 }
 0x11c   : > { %v1129_v63 = vadd.f32 %v1128_v41, %v1127_v9 }
 0x11d   : > { %v1208_v43 = vadd.f32 %v1207_v30, %v1206_v35 }
 0x11e   : > { %v1131_v1 = vadd.f32 %v1130_v57, %v1129_v63 }
 0x11f   : > { %v1209_v45 = vmul.f32 %v1862_v37, %v1208_v43 }
 0x120   : > { %v1133_v21 = vadd.f32 %v1132_v10, %v1131_v1 }
 0x121   : > { %v1211_v47 = vmul.f32 %v1944_v44, %v1209_v45 }
 0x122   : > { %2039 = vlog2.f32 %v1133_v21 }
 0x123   : > { %v2680_v41 = vadd.f32 %v1211_v47, %v2594_v31 }
 0x128   : > { %v2040_v36 = vpop.eup %2039 }
 0x129   : > { %v1135_v40 = vmul.f32 0.6931472, %v2040_v36 }
 0x12b   : > { %v1136_v6 = vadd.f32 %v1135_v40, %v2613_v25 }
 0x12d   : > { %v2673_v46 = vsel %vm1140_vm8, %v1136_v6, %v2587_v22 }
 0x12e   : > { %v1214_v18 = vrot.slane %v2673_v46, 1  ;;  %v1215_v55 = vrot.slane %v2673_v46, 2  ;;  %v1216_v12 = vrot.slane %v2673_v46, 3  ;;  %v1217_v32 = vrot.slane %v2673_v46, 4 }
 0x12f   : > { %v1218_v34 = vrot.slane %v2673_v46, 5  ;;  %v1219_v25 = vrot.slane %v2673_v46, 6  ;;  %v1220_v7 = vrot.slane %v2673_v46, 7  ;;  %v1221_v22 = vperm.slane %v2673_v46, 0 }
 0x130   : > { %v1222_v9 = vperm.slane %v1214_v18, 0  ;;  %v1223_v24 = vperm.slane %v1215_v55, 0  ;;  %v1224_v53 = vperm.slane %v1216_v12, 0  ;;  %v1225_v56 = vperm.slane %v1217_v32, 0 }
 0x131   : > { %v1226_v57 = vperm.slane %v1218_v34, 0  ;;  %v1227_v60 = vperm.slane %v1219_v25, 0  ;;  %v1228_v62 = vperm.slane %v1220_v7, 0  ;;  %v1237_v63 = vadd.f32 %v2633_v48, %v1221_v22 }
 0x132   : > { %v1238_v31 = vadd.f32 %v2636_v52, %v1222_v9  ;;  %v1239_v0 = vadd.f32 %v2639_v33, %v1223_v24  ;;  %v1240_v2 = vadd.f32 %v2642_v38, %v1224_v53  ;;  %v1241_v5 = vadd.f32 %v2649_v59, %v1225_v56 }
 0x133   : > { %v1242_v16 = vadd.f32 %v1858_v17, %v1226_v57  ;;  %v1243_v10 = vadd.f32 %v1859_v11, %v1227_v60  ;;  %v1244_v42 = vadd.f32 %v1860_v23, %v1228_v62  ;;  %v1245_v51 = vsel %vm366_vm1, %v1237_v63, -inf }
 0x134   : > { %v1246_v1 = vsel %vm366_vm1, %v1238_v31, -inf  ;;  %v1247_v14 = vsel %vm366_vm1, %v1239_v0, -inf  ;;  %v1248_v19 = vsel %vm366_vm1, %v1240_v2, -inf  ;;  %v1249_v48 = vsel %vm366_vm1, %v1241_v5, -inf }
 0x135   : > { %v1251_v52 = vsel %vm366_vm1, %v1242_v16, -inf  ;;  %v1253_v33 = vsel %vm366_vm1, %v1243_v10, -inf  ;;  %v1255_v38 = vsel %vm366_vm1, %v1244_v42, -inf  ;;  %v1250_v59 = vmax.f32 %v1245_v51, %v1249_v48 }
 0x136   : > { %v1252_v17 = vmax.f32 %v1246_v1, %v1251_v52  ;;  %v1254_v20 = vmax.f32 %v1247_v14, %v1253_v33  ;;  %v1256_v11 = vmax.f32 %v1248_v19, %v1255_v38  ;;  %v1863_v52 = vld [vmem:[%s2202_s29 + $0x180] sm:$0xff]  ;;  %v1864_v33 = vld [vmem:[%s2202_s29 + $0x188] sm:$0xff] }
 0x138   : > { %v1257_v15 = vmax.f32 %v1250_v59, %v1252_v17  ;;  %v1258_v21 = vmax.f32 %v1254_v20, %v1256_v11  ;;  %v1865_v17 = vld [vmem:[%s2202_s29 + $0x190] sm:$0xff]  ;;  %v2724_v20 = vld [vmem:[%s2202_s29 + $0x198] sm:$0xff] }
 0x13a   : > { %v1259_v49 = vmax.f32 %v1257_v15, %v1258_v21 }
 0x13c   : > { %v1260_v29 = vsub.f32 %v1237_v63, %v1259_v49  ;;  %v1261_v23 = vsub.f32 %v1238_v31, %v1259_v49  ;;  %v1262_v26 = vsub.f32 %v1239_v0, %v1259_v49  ;;  %v1263_v27 = vsub.f32 %v1240_v2, %v1259_v49  ;;  %v1151_v63 = vld [vmem:[%s2212_s9 + $0x5] sm:$0x1] }
 0x13d   : > { %v1264_v3 = vsub.f32 %v1241_v5, %v1259_v49  ;;  %v1265_v28 = vsub.f32 %v1242_v16, %v1259_v49  ;;  %v1266_v61 = vsub.f32 %v1243_v10, %v1259_v49  ;;  %v1267_v35 = vsub.f32 %v1244_v42, %v1259_v49  ;;  %v1945_v5 = vld [vmem:[%s2197_s26 + $0x6] ss:$0 sm:$0xff] }
 0x13e   : > { %v1268_v8 = vmul.f32 1.442695, %v1260_v29  ;;  %v1270_v39 = vmul.f32 1.442695, %v1261_v23  ;;  %v1272_v50 = vmul.f32 1.442695, %v1262_v26  ;;  %vm1320_vm10 = vcmp.eq.s32.totalorder %v2218_v4, %v1945_v5 }
 0x13f   : > { %v1274_v54 = vmul.f32 1.442695, %v1263_v27  ;;  %v1276_v30 = vmul.f32 1.442695, %v1264_v3  ;;  %v1278_v36 = vmul.f32 1.442695, %v1265_v28 }
 0x140   : > { %2041 = vpow2.f32 %v1268_v8  ;;  %v1280_v37 = vmul.f32 1.442695, %v1266_v61  ;;  %v1282_v40 = vmul.f32 1.442695, %v1267_v35  ;;  %vm1302_vm9 = vcmp.gt.f32.partialorder %v1151_v63, 0.5  ;;  %v2734_v29 = vld [vmem:[%s2202_s29 + $0x1a8] sm:$0xff] }
 0x141   : > { %2043 = vpow2.f32 %v1270_v39  ;;  %v1303_v16 = vsel %vm1302_vm9, 1, %v2143_v58  ;;  %v2712_v51 = vsel %vm1320_vm10, 1.0, %v2142_v13  ;;  %v2740_v28 = vld [vmem:[%s2202_s29 + $0x1b0] sm:$0xff]  ;;  %v2743_v8 = vld [vmem:[%s2202_s29 + $0x1b8] sm:$0xff] }
 0x142   : > { %2045 = vpow2.f32 %v1272_v50  ;;  %v1304_v10 = vperm.slane %v1303_v16, 0  ;;  %v1328_v19 = vrot.slane %v2712_v51, 1  ;;  %v1329_v38 = vrot.slane %v2712_v51, 2 }
 0x143   : > { %2047 = vpow2.f32 %v1274_v54  ;;  %v1335_v59 = vperm.slane %v2712_v51, 0 }
 0x144   : > { %2049 = vpow2.f32 %v1276_v30  ;;  %vm1305_vm11 = vcmp.eq.s32.totalorder %v1304_v10, 1  ;;  %v1336_v23 = vperm.slane %v1328_v19, 0  ;;  %v1337_v63 = vperm.slane %v1329_v38, 0 }
 0x145   : > { %2051 = vpow2.f32 %v1278_v36  ;;  %v1331_v10 = vrot.slane %v2712_v51, 4 }
 0x146   : > { %v2042_v43 = vpop.eup %2041  ;;  %2053 = vpow2.f32 %v1280_v37  ;;  %v1352_v5 = vmul.f32 %v1864_v33, %v1336_v23 }
 0x147   : > { %v2044_v44 = vpop.eup %2043  ;;  %v1284_v6 = vsel %vm366_vm1, %v2042_v43, 0.0  ;;  %2055 = vpow2.f32 %v1282_v40 }
 0x148   : > { %v2046_v45 = vpop.eup %2045  ;;  %v1285_v47 = vsel %vm366_vm1, %v2044_v44, 0.0 }
 0x149   : > { %v2048_v18 = vpop.eup %2047  ;;  %v1286_v55 = vadd.f32 %v1285_v47, %v1284_v6  ;;  %v1287_v12 = vsel %vm366_vm1, %v2046_v45, 0.0 }
 0x14a   : > { %v2050_v32 = vpop.eup %2049  ;;  %v1289_v34 = vsel %vm366_vm1, %v2048_v18, 0.0 }
 0x14b   : > { %v2052_v25 = vpop.eup %2051  ;;  %v1288_v7 = vadd.f32 %v1287_v12, %v1286_v55  ;;  %v1291_v22 = vsel %vm366_vm1, %v2050_v32, 0.0 }
 0x14c   : > { %v2054_v9 = vpop.eup %2053  ;;  %v1293_v53 = vsel %vm366_vm1, %v2052_v25, 0.0 }
 0x14d   : > { %v1290_v24 = vadd.f32 %v1289_v34, %v1288_v7  ;;  %v2056_v56 = vpop.eup %2055  ;;  %v1295_v60 = vsel %vm366_vm1, %v2054_v9, 0.0 }
 0x14e   : > { %v1297_v31 = vsel %vm366_vm1, %v2056_v56, 0.0 }
 0x14f   : > { %v1292_v57 = vadd.f32 %v1291_v22, %v1290_v24 }
 0x151   : > { %v1294_v62 = vadd.f32 %v1293_v53, %v1292_v57 }
 0x153   : > { %v1296_v0 = vadd.f32 %v1295_v60, %v1294_v62  ;;  %v1330_v62 = vrot.slane %v2712_v51, 3 }
 0x155   : > { %v1298_v2 = vadd.f32 %v1297_v31, %v1296_v0 }
 0x157   : > { %2057 = vlog2.f32 %v1298_v2  ;;  %v1351_v2 = vmul.f32 %v1863_v52, %v1335_v59 }
 0x159   : > { %v1359_v38 = vsel %vm366_vm1, %v1351_v2, 0.0 }
 0x15d   : > { %v2058_v42 = vpop.eup %2057 }
 0x15e   : > { %v1300_v1 = vmul.f32 0.6931472, %v2058_v42  ;;  %v1338_v42 = vperm.slane %v1330_v62, 0 }
 0x160   : > { %v1301_v14 = vadd.f32 %v1300_v1, %v1259_v49  ;;  %v2731_v49 = vld [vmem:[%s2202_s29 + $0x1a0] sm:$0xff]  ;;  %v1353_v1 = vmul.f32 %v1865_v17, %v1337_v63 }
 0x162   : > { %v2716_v48 = vsel %vm1305_vm11, %v1301_v14, %v2673_v46 }
 0x163   : > { %v1379_v11 = vrot.slane %v2716_v48, 1  ;;  %v1380_v15 = vrot.slane %v2716_v48, 2  ;;  %v1381_v21 = vrot.slane %v2716_v48, 3  ;;  %v1382_v46 = vrot.slane %v2716_v48, 4 }
 0x164   : > { %v1383_v26 = vrot.slane %v2716_v48, 5  ;;  %v1384_v27 = vrot.slane %v2716_v48, 6  ;;  %v1385_v3 = vrot.slane %v2716_v48, 7  ;;  %v1386_v39 = vperm.slane %v2716_v48, 0 }
 0x165   : > { %v1387_v50 = vperm.slane %v1379_v11, 0  ;;  %v1388_v61 = vperm.slane %v1380_v15, 0  ;;  %v1389_v54 = vperm.slane %v1381_v21, 0  ;;  %v1390_v30 = vperm.slane %v1382_v46, 0 }
 0x166   : > { %v1391_v35 = vperm.slane %v1383_v26, 0  ;;  %v1392_v36 = vperm.slane %v1384_v27, 0  ;;  %v1393_v37 = vperm.slane %v1385_v3, 0  ;;  %v1402_v40 = vadd.f32 %v1863_v52, %v1386_v39 }
 0x167   : > { %v1403_v43 = vadd.f32 %v1864_v33, %v1387_v50  ;;  %v1404_v44 = vadd.f32 %v1865_v17, %v1388_v61  ;;  %v1405_v6 = vadd.f32 %v2724_v20, %v1389_v54  ;;  %v1406_v45 = vadd.f32 %v2731_v49, %v1390_v30 }
 0x168   : > { %v1407_v47 = vadd.f32 %v2734_v29, %v1391_v35  ;;  %v1408_v18 = vadd.f32 %v2740_v28, %v1392_v36  ;;  %v1409_v55 = vadd.f32 %v2743_v8, %v1393_v37  ;;  %v1410_v12 = vsel %vm366_vm1, %v1402_v40, -inf }
 0x169   : > { %v1411_v32 = vsel %vm366_vm1, %v1403_v43, -inf  ;;  %v1412_v34 = vsel %vm366_vm1, %v1404_v44, -inf  ;;  %v1413_v25 = vsel %vm366_vm1, %v1405_v6, -inf  ;;  %v1414_v7 = vsel %vm366_vm1, %v1406_v45, -inf }
 0x16a   : > { %v1416_v22 = vsel %vm366_vm1, %v1407_v47, -inf  ;;  %v1418_v9 = vsel %vm366_vm1, %v1408_v18, -inf  ;;  %v1420_v24 = vsel %vm366_vm1, %v1409_v55, -inf  ;;  %v1415_v53 = vmax.f32 %v1410_v12, %v1414_v7 }
 0x16b   : > { %v1417_v56 = vmax.f32 %v1411_v32, %v1416_v22  ;;  %v1419_v57 = vmax.f32 %v1412_v34, %v1418_v9  ;;  %v1421_v60 = vmax.f32 %v1413_v25, %v1420_v24  ;;  %v1360_v21 = vsel %vm366_vm1, %v1352_v5, 0.0 }
 0x16c   : > { %v1332_v17 = vrot.slane %v2712_v51, 5  ;;  %v1361_v3 = vadd.f32 %v1360_v21, %v1359_v38  ;;  %v1354_v61 = vmul.f32 %v2724_v20, %v1338_v42  ;;  %v1362_v54 = vsel %vm366_vm1, %v1353_v1, 0.0  ;;  %v1948_v20 = vld [vmem:[%s2197_s26 + $0x7] ss:$0 sm:$0xff] }
 0x16d   : > { %v1422_v31 = vmax.f32 %v1415_v53, %v1417_v56  ;;  %v1423_v0 = vmax.f32 %v1419_v57, %v1421_v60  ;;  %v1333_v35 = vrot.slane %v2712_v51, 6  ;;  %v1334_v36 = vrot.slane %v2712_v51, 7 }
 0x16e   : > { %v1339_v37 = vperm.slane %v1331_v10, 0  ;;  %vm1485_vm12 = vcmp.eq.s32.totalorder %v2218_v4, %v1948_v20 }
 0x16f   : > { %v2760_v16 = vmax.f32 %v1422_v31, %v1423_v0  ;;  %v1881_v9 = vsel %vm1485_vm12, 1.0, %v2142_v13 }
 0x170   : > { %v1355_v12 = vmul.f32 %v2731_v49, %v1339_v37  ;;  %v1493_v49 = vrot.slane %v1881_v9, 1  ;;  %v1494_v57 = vrot.slane %v1881_v9, 2  ;;  %v1495_v62 = vrot.slane %v1881_v9, 3 }
 0x171   : > { %v1425_v14 = vsub.f32 %v1402_v40, %v2760_v16  ;;  %v1426_v19 = vsub.f32 %v1403_v43, %v2760_v16  ;;  %v1427_v11 = vsub.f32 %v1404_v44, %v2760_v16  ;;  %v1428_v15 = vsub.f32 %v1405_v6, %v2760_v16 }
 0x172   : > { %v1429_v52 = vsub.f32 %v1406_v45, %v2760_v16  ;;  %v1430_v33 = vsub.f32 %v1407_v47, %v2760_v16  ;;  %v1431_v26 = vsub.f32 %v1408_v18, %v2760_v16  ;;  %v1432_v39 = vsub.f32 %v1409_v55, %v2760_v16 }
 0x173   : > { %v1433_v59 = vmul.f32 1.442695, %v1425_v14  ;;  %v1435_v46 = vmul.f32 1.442695, %v1426_v19  ;;  %v1437_v23 = vmul.f32 1.442695, %v1427_v11  ;;  %v1363_v44 = vadd.f32 %v1362_v54, %v1361_v3 }
 0x174   : > { %v1439_v27 = vmul.f32 1.442695, %v1428_v15  ;;  %v1441_v50 = vmul.f32 1.442695, %v1429_v52  ;;  %v1443_v30 = vmul.f32 1.442695, %v1430_v33 }
 0x175   : > { %2059 = vpow2.f32 %v1433_v59  ;;  %v1340_v40 = vperm.slane %v1332_v17, 0  ;;  %v1445_v43 = vmul.f32 1.442695, %v1431_v26  ;;  %v1447_v6 = vmul.f32 1.442695, %v1432_v39  ;;  %v2795_v17 = vld [vmem:[%s2202_s29 + $0x1c0] sm:$0xff] }
 0x176   : > { %2061 = vpow2.f32 %v1435_v46  ;;  %v1364_v45 = vsel %vm366_vm1, %v1354_v61, 0.0  ;;  %v1341_v18 = vperm.slane %v1333_v35, 0  ;;  %v1342_v55 = vperm.slane %v1334_v36, 0  ;;  %v2798_v26 = vld [vmem:[%s2202_s29 + $0x1c8] sm:$0xff]  ;;  %v2811_v35 = vld [vmem:[%s2202_s29 + $0x1e0] sm:$0xff] }
 0x177   : > { %2063 = vpow2.f32 %v1437_v23  ;;  %v1356_v51 = vmul.f32 %v2734_v29, %v1340_v40  ;;  %v1365_v7 = vadd.f32 %v1364_v45, %v1363_v44  ;;  %v1496_v63 = vrot.slane %v1881_v9, 4 }
 0x178   : > { %2065 = vpow2.f32 %v1439_v27  ;;  %v1497_v31 = vrot.slane %v1881_v9, 5  ;;  %v1357_v2 = vmul.f32 %v2740_v28, %v1341_v18  ;;  %v1366_v5 = vsel %vm366_vm1, %v1355_v12, 0.0  ;;  %v2801_v27 = vld [vmem:[%s2202_s29 + $0x1d0] sm:$0xff] }
 0x179   : > { %2067 = vpow2.f32 %v1441_v50  ;;  %v1498_v1 = vrot.slane %v1881_v9, 6  ;;  %v1500_v14 = vperm.slane %v1881_v9, 0  ;;  %v1501_v19 = vperm.slane %v1493_v49, 0 }
 0x17a   : > { %2069 = vpow2.f32 %v1443_v30  ;;  %v1502_v11 = vperm.slane %v1494_v57, 0  ;;  %v1358_v38 = vmul.f32 %v2743_v8, %v1342_v55  ;;  %v1503_v52 = vperm.slane %v1495_v62, 0  ;;  %v2804_v8 = vld [vmem:[%s2202_s29 + $0x1d8] sm:$0xff]  ;;  %v2820_v55 = vld [vmem:[%s2202_s29 + $0x1e8] sm:$0xff] }
 0x17b   : > { %v2060_v47 = vpop.eup %2059  ;;  %2071 = vpow2.f32 %v1445_v43  ;;  %v1504_v28 = vperm.slane %v1496_v63, 0  ;;  %v1367_v59 = vadd.f32 %v1366_v5, %v1365_v7  ;;  %v1368_v46 = vsel %vm366_vm1, %v1356_v51, 0.0  ;;  %v1316_v43 = vld [vmem:[%s2212_s9 + $0x6] sm:$0x1] }
 0x17c   : > { %v2062_v32 = vpop.eup %2061  ;;  %v1449_v34 = vsel %vm366_vm1, %v2060_v47, 0.0  ;;  %2073 = vpow2.f32 %v1447_v6  ;;  %v1505_v3 = vperm.slane %v1497_v31, 0  ;;  %v1516_v50 = vmul.f32 %v2795_v17, %v1500_v14 }
 0x17d   : > { %v2064_v25 = vpop.eup %2063  ;;  %v1450_v22 = vsel %vm366_vm1, %v2062_v32, 0.0  ;;  %v1517_v61 = vmul.f32 %v2798_v26, %v1501_v19  ;;  %v1518_v54 = vmul.f32 %v2801_v27, %v1502_v11  ;;  %v1499_v36 = vrot.slane %v1881_v9, 7  ;;  %v1879_v9 = vld [vmem:[%s2202_s29 + $0x1f0] sm:$0xff] }
 0x17e   : > { %v2066_v24 = vpop.eup %2065  ;;  %v1451_v53 = vadd.f32 %v1450_v22, %v1449_v34  ;;  %v1452_v56 = vsel %vm366_vm1, %v2064_v25, 0.0  ;;  %v1506_v37 = vperm.slane %v1498_v1, 0  ;;  %v1519_v40 = vmul.f32 %v2804_v8, %v1503_v52  ;;  %v1946_v22 = vld [vmem:[%s2207_s6 + $0x6] ss:$0 sm:$0xff]  ;;  %v1949_v1 = vld [vmem:[%s2207_s6 + $0x7] ss:$0 sm:$0xff] }
 0x17f   : > { %v2068_v60 = vpop.eup %2067  ;;  %v1454_v29 = vsel %vm366_vm1, %v2066_v24, 0.0  ;;  %v1520_v6 = vmul.f32 %v2811_v35, %v1504_v28  ;;  %v1524_v45 = vsel %vm366_vm1, %v1516_v50, 0.0  ;;  %v1525_v20 = vsel %vm366_vm1, %v1517_v61, 0.0  ;;  %v1947_v28 = vld [vmem:[%s2212_s9 + $0x6] ss:$0 sm:$0xff] }
 0x180   : > { %v2070_v0 = vpop.eup %2069  ;;  %v1453_v10 = vadd.f32 %v1452_v56, %v1451_v53  ;;  %v1456_v42 = vsel %vm366_vm1, %v2068_v60, 0.0  ;;  %v1369_v47 = vadd.f32 %v1368_v46, %v1367_v59  ;;  %v1526_v12 = vadd.f32 %v1525_v20, %v1524_v45 }
 0x181   : > { %v2072_v15 = vpop.eup %2071  ;;  %v1458_v23 = vsel %vm366_vm1, %v2070_v0, 0.0  ;;  %v1527_v32 = vsel %vm366_vm1, %v1518_v54, 0.0  ;;  %v1370_v51 = vsel %vm366_vm1, %v1357_v2, 0.0  ;;  %v1521_v25 = vmul.f32 %v2820_v55, %v1505_v3  ;;  %v1880_v0 = vld [vmem:[%s2202_s29 + $0x1f8] sm:$0xff] }
 0x182   : > { %v1455_v21 = vadd.f32 %v1454_v29, %v1453_v10  ;;  %v2074_v33 = vpop.eup %2073  ;;  %v1460_v30 = vsel %vm366_vm1, %v2072_v15, 0.0  ;;  %v1529_v7 = vsel %vm366_vm1, %v1519_v40, 0.0  ;;  %vm1467_vm13 = vcmp.gt.f32.partialorder %v1316_v43, 0.5 }
 0x183   : > { %v1462_v18 = vsel %vm366_vm1, %v2074_v33, 0.0  ;;  %v1528_v24 = vadd.f32 %v1527_v32, %v1526_v12  ;;  %v1507_v56 = vperm.slane %v1499_v36, 0  ;;  %v1522_v49 = vmul.f32 %v1879_v9, %v1506_v37 }
 0x184   : > { %v1457_v39 = vadd.f32 %v1456_v42, %v1455_v21  ;;  %v1531_v57 = vsel %vm366_vm1, %v1520_v6, 0.0  ;;  %v1371_v60 = vadd.f32 %v1370_v51, %v1369_v47  ;;  %v1372_v62 = vsel %vm366_vm1, %v1358_v38, 0.0 }
 0x185   : > { %v1530_v29 = vadd.f32 %v1529_v7, %v1528_v24  ;;  %v1533_v63 = vsel %vm366_vm1, %v1521_v25, 0.0  ;;  %vm1324_vm14 = vcmp.eq.s32.totalorder %v2218_v4, %v1946_v22  ;;  %v1468_v31 = vsel %vm1467_vm13, 1, %v2143_v58 }
 0x186   : > { %v1459_v44 = vadd.f32 %v1458_v23, %v1457_v39  ;;  %v1523_v5 = vmul.f32 %v1880_v0, %v1507_v56  ;;  %v1535_v10 = vsel %vm366_vm1, %v1522_v49, 0.0  ;;  %v1373_v42 = vadd.f32 %v1372_v62, %v1371_v60  ;;  %v1950_v56 = vld [vmem:[%s2212_s9 + $0x7] ss:$0 sm:$0xff] }
 0x187   : > { %v1532_v2 = vadd.f32 %v1531_v57, %v1530_v29  ;;  %v1872_v19 = vsel %vm1324_vm14, 1.0, %v2142_v13  ;;  %v1469_v11 = vperm.slane %v1468_v31, 0  ;;  %vm1489_vm15 = vcmp.eq.s32.totalorder %v2218_v4, %v1949_v1 }
 0x188   : > { %v1461_v34 = vadd.f32 %v1460_v30, %v1459_v44  ;;  %v1537_v21 = vsel %vm366_vm1, %v1523_v5, 0.0  ;;  %v1374_v52 = vmul.f32 %v1872_v19, %v1373_v42  ;;  %v1882_v23 = vsel %vm1489_vm15, 1.0, %v2142_v13 }
 0x189   : > { %v1534_v14 = vadd.f32 %v1533_v63, %v1532_v2  ;;  %vm1470_vm0 = vcmp.eq.s32.totalorder %v1469_v11, 1 }
 0x18a   : > { %v1463_v53 = vadd.f32 %v1462_v18, %v1461_v34  ;;  %v1376_v3 = vmul.f32 %v1947_v28, %v1374_v52  ;;  %v1638_v28 = vld [vmem:[#allocation3] sm:$0xff] }
 0x18b   : > { %v1536_v15 = vadd.f32 %v1535_v10, %v1534_v14 }
 0x18c   : > { %2075 = vlog2.f32 %v1463_v53  ;;  %v1377_v62 = vadd.f32 %v1376_v3, %v2680_v41 }
 0x18d   : > { %v1538_v46 = vadd.f32 %v1537_v21, %v1536_v15 }
 0x18f   : > { %v1539_v36 = vmul.f32 %v1882_v23, %v1538_v46 }
 0x191   : > { %v1541_v63 = vmul.f32 %v1950_v56, %v1539_v36 }
 0x192   : > { %v2076_v38 = vpop.eup %2075 }
 0x193   : > { %v1465_v33 = vmul.f32 0.6931472, %v2076_v38  ;;  %v1542_v42 = vadd.f32 %v1541_v63, %v1377_v62 }
 0x195   : > { %v1466_v59 = vadd.f32 %v1465_v33, %v2760_v16 }
 0x197   : > { %v2843_v39 = vsel %vm1470_vm0, %v1466_v59, %v2716_v48  ;;  %v1639_v59 = vadd.f32 %v1638_v28, %v1542_v42 }
 0x198   : > { %v1544_v50 = vrot.slane %v2843_v39, 1  ;;  %v1545_v61 = vrot.slane %v2843_v39, 2  ;;  %v1546_v54 = vrot.slane %v2843_v39, 3  ;;  %v1547_v30 = vrot.slane %v2843_v39, 4 }
 0x199   : > { %v1548_v4 = vrot.slane %v2843_v39, 5  ;;  %v1549_v16 = vrot.slane %v2843_v39, 6  ;;  %v1550_v37 = vrot.slane %v2843_v39, 7  ;;  %v1551_v13 = vperm.slane %v2843_v39, 0  ;;  %1640 = vst.msk [vmem:[#allocation3] sm:$0xff] %vm366_vm1, %v1639_v59 }
 0x19a   : > { %v1552_v40 = vperm.slane %v1544_v50, 0  ;;  %v1553_v48 = vperm.slane %v1545_v61, 0  ;;  %v1554_v43 = vperm.slane %v1546_v54, 0  ;;  %v1555_v44 = vperm.slane %v1547_v30, 0 }
 0x19b   : > { %v1556_v6 = vperm.slane %v1548_v4, 0  ;;  %v1557_v45 = vperm.slane %v1549_v16, 0  ;;  %v1558_v20 = vperm.slane %v1550_v37, 0  ;;  %v1567_v47 = vadd.f32 %v2795_v17, %v1551_v13 }
 0x19c   : > { %v1568_v18 = vadd.f32 %v2798_v26, %v1552_v40  ;;  %v1569_v12 = vadd.f32 %v2801_v27, %v1553_v48  ;;  %v1570_v32 = vadd.f32 %v2804_v8, %v1554_v43  ;;  %v1571_v51 = vadd.f32 %v2811_v35, %v1555_v44 }
 0x19d   : > { %v1572_v34 = vadd.f32 %v2820_v55, %v1556_v6  ;;  %v1573_v25 = vadd.f32 %v1879_v9, %v1557_v45  ;;  %v1574_v7 = vadd.f32 %v1880_v0, %v1558_v20  ;;  %v1575_v22 = vsel %vm366_vm1, %v1567_v47, -inf }
 0x19e   : > { %v1576_v24 = vsel %vm366_vm1, %v1568_v18, -inf  ;;  %v1577_v53 = vsel %vm366_vm1, %v1569_v12, -inf  ;;  %v1578_v17 = vsel %vm366_vm1, %v1570_v32, -inf  ;;  %v1579_v26 = vsel %vm366_vm1, %v1571_v51, -inf }
 0x19f   : > { %v1581_v27 = vsel %vm366_vm1, %v1572_v34, -inf  ;;  %v1583_v8 = vsel %vm366_vm1, %v1573_v25, -inf  ;;  %v1585_v35 = vsel %vm366_vm1, %v1574_v7, -inf  ;;  %v1580_v55 = vmax.f32 %v1575_v22, %v1579_v26 }
 0x1a0   : > { %v1582_v9 = vmax.f32 %v1576_v24, %v1581_v27  ;;  %v1584_v49 = vmax.f32 %v1577_v53, %v1583_v8  ;;  %v1586_v57 = vmax.f32 %v1578_v17, %v1585_v35 }
 0x1a2   : > { %v1587_v60 = vmax.f32 %v1580_v55, %v1582_v9  ;;  %v1588_v29 = vmax.f32 %v1584_v49, %v1586_v57 }
 0x1a4   : > { %v1589_v31 = vmax.f32 %v1587_v60, %v1588_v29 }
 0x1a6   : > { %v1590_v0 = vsub.f32 %v1567_v47, %v1589_v31  ;;  %v1591_v2 = vsub.f32 %v1568_v18, %v1589_v31  ;;  %v1592_v5 = vsub.f32 %v1569_v12, %v1589_v31  ;;  %v1593_v10 = vsub.f32 %v1570_v32, %v1589_v31  ;;  %v1481_v32 = vld [vmem:[%s2212_s9 + $0x7] sm:$0x1] }
 0x1a7   : > { %v1594_v1 = vsub.f32 %v1571_v51, %v1589_v31  ;;  %v1595_v14 = vsub.f32 %v1572_v34, %v1589_v31  ;;  %v1596_v38 = vsub.f32 %v1573_v25, %v1589_v31  ;;  %v1597_v33 = vsub.f32 %v1574_v7, %v1589_v31 }
 0x1a8   : > { %v1598_v19 = vmul.f32 1.442695, %v1590_v0  ;;  %v1600_v11 = vmul.f32 1.442695, %v1591_v2  ;;  %v1602_v15 = vmul.f32 1.442695, %v1592_v5 }
 0x1a9   : > { %v1604_v21 = vmul.f32 1.442695, %v1593_v10  ;;  %v1606_v52 = vmul.f32 1.442695, %v1594_v1  ;;  %v1608_v41 = vmul.f32 1.442695, %v1595_v14 }
 0x1aa   : > { %2077 = vpow2.f32 %v1598_v19  ;;  %v1610_v46 = vmul.f32 1.442695, %v1596_v38  ;;  %v1612_v23 = vmul.f32 1.442695, %v1597_v33  ;;  %vm1632_vm2 = vcmp.gt.f32.partialorder %v1481_v32, 0.5 }
 0x1ab   : > { %2079 = vpow2.f32 %v1600_v11  ;;  %v1633_v7 = vsel %vm1632_vm2, 1, %v2143_v58 }
 0x1ac   : > { %2081 = vpow2.f32 %v1602_v15  ;;  %v1634_v22 = vperm.slane %v1633_v7, 0 }
 0x1ad   : > { %2083 = vpow2.f32 %v1604_v21 }
 0x1ae   : > { %2085 = vpow2.f32 %v1606_v52  ;;  %vm1635_vm3 = vcmp.eq.s32.totalorder %v1634_v22, 1 }
 0x1af   : > { %2087 = vpow2.f32 %v1608_v41 }
 0x1b0   : > { %v2078_v3 = vpop.eup %2077  ;;  %2089 = vpow2.f32 %v1610_v46 }
 0x1b1   : > { %v2080_v50 = vpop.eup %2079  ;;  %v1614_v61 = vsel %vm366_vm1, %v2078_v3, 0.0  ;;  %2091 = vpow2.f32 %v1612_v23 }
 0x1b2   : > { %v2082_v54 = vpop.eup %2081  ;;  %v1615_v30 = vsel %vm366_vm1, %v2080_v50, 0.0 }
 0x1b3   : > { %v2084_v36 = vpop.eup %2083  ;;  %v1616_v4 = vadd.f32 %v1615_v30, %v1614_v61  ;;  %v1617_v16 = vsel %vm366_vm1, %v2082_v54, 0.0 }
 0x1b4   : > { %v2086_v37 = vpop.eup %2085  ;;  %v1619_v13 = vsel %vm366_vm1, %v2084_v36, 0.0 }
 0x1b5   : > { %v2088_v40 = vpop.eup %2087  ;;  %v1618_v48 = vadd.f32 %v1617_v16, %v1616_v4  ;;  %v1621_v43 = vsel %vm366_vm1, %v2086_v37, 0.0 }
 0x1b6   : > { %v2090_v44 = vpop.eup %2089  ;;  %v1623_v45 = vsel %vm366_vm1, %v2088_v40, 0.0 }
 0x1b7   : > { %v1620_v6 = vadd.f32 %v1619_v13, %v1618_v48  ;;  %v2092_v20 = vpop.eup %2091  ;;  %v1625_v18 = vsel %vm366_vm1, %v2090_v44, 0.0 }
 0x1b8   : > { %v1627_v51 = vsel %vm366_vm1, %v2092_v20, 0.0 }
 0x1b9   : > { %v1622_v47 = vadd.f32 %v1621_v43, %v1620_v6 }
 0x1bb   : > { %v1624_v12 = vadd.f32 %v1623_v45, %v1622_v47 }
 0x1bd   : > { %v1626_v34 = vadd.f32 %v1625_v18, %v1624_v12 }
 0x1bf   : > { %v1628_v25 = vadd.f32 %v1627_v51, %v1626_v34 }
 0x1c1   : > { %2093 = vlog2.f32 %v1628_v25 }
 0x1c7   : > { %v2094_v24 = vpop.eup %2093 }
 0x1c8   : > { %v1630_v53 = vmul.f32 0.6931472, %v2094_v24 }
 0x1c9   : > { %1644 = sbr.rel (%p1883_p8) target bundleno = 707 (0x2c3), region = 44 }
 0x1ca   : > { %v1631_v17 = vadd.f32 %v1630_v53, %v1589_v31 }
 0x1cc   : > { %v1636_v56 = vsel %vm1635_vm3, %v1631_v17, %v2843_v39 }
 0x1cd   : > { %1637 = vst.msk [vmem:[#allocation2] sm:$0xff] %vm366_vm1, %v1636_v56 }
 0x1ce   : > { %vm1666_vm4 = vcmask 8192   ;;  %v1677_v19 = vld [vmem:[#allocation3] sm:$0xff] }
 0x1cf   : > { %v1678_v11 = vsel %vm366_vm1, %v1677_v19, 0.0 }
 0x1d4   : > { %v1645_v26 = vld [vmem:[#allocation2] sm:$0xff] }
 0x1d5   : > { %v1646_v27 = vsel %vm366_vm1, %v1645_v26, -inf }
 0x1d6   : > { %v1647_v8 = vrot.slane %v1646_v27, 4 }
 0x1d8   : > { %v1648_v35 = vmax.f32 %v1646_v27, %v1647_v8 }
 0x1da   : > { %v1649_v55 = vrot.slane %v1648_v35, 2 }
 0x1dc   : > { %v1650_v9 = vmax.f32 %v1648_v35, %v1649_v55 }
 0x1de   : > { %v1651_v58 = vrot.slane %v1650_v9, 1 }
 0x1e0   : > { %v1652_v49 = vmax.f32 %v1650_v9, %v1651_v58 }
 0x1e2   : > { %v1653_v57 = vsub.f32 %v1645_v26, %v1652_v49 }
 0x1e4   : > { %v1654_v60 = vmul.f32 1.442695, %v1653_v57 }
 0x1e6   : > { %2095 = vpow2.f32 %v1654_v60 }
 0x1ec   : > { %v2096_v29 = vpop.eup %2095 }
 0x1ed   : > { %v1656_v39 = vsel %vm366_vm1, %v2096_v29, 0.0 }
 0x1ee   : > { %v1657_v62 = vrot.slane %v1656_v39, 4 }
 0x1f0   : > { %v1658_v63 = vadd.f32 %v1657_v62, %v1656_v39 }
 0x1f2   : > { %v1659_v31 = vrot.slane %v1658_v63, 2 }
 0x1f4   : > { %v1660_v0 = vadd.f32 %v1659_v31, %v1658_v63 }
 0x1f6   : > { %v1661_v2 = vrot.slane %v1660_v0, 1 }
 0x1f8   : > { %v1662_v5 = vadd.f32 %v1661_v2, %v1660_v0 }
 0x1fa   : > { %2097 = vlog2.f32 %v1662_v5 }
 0x200   : > { %v2098_v10 = vpop.eup %2097 }
 0x201   : > { %v1664_v42 = vmul.f32 0.6931472, %v2098_v10 }
 0x203   : > { %v1665_v1 = vadd.f32 %v1664_v42, %v1652_v49 }
 0x205   : > { %v1667_v14 = vsel %vm1666_vm4, %v1665_v1, 0.0 }
 0x206   : > { %1668 = vadd.xlane.f32.xlu0 %v1667_v14 }
 0x20e   : > { %1679 = vadd.xlane.f32.xlu0 %v1678_v11 }
 0x279   : > { %v1669_v15 = vpop.xlane.xlu0 %1668 }
 0x27a   : > { %v1670_v38 = vrot.slane %v1669_v15, 4 }
 0x27c   : > { %v1671_v21 = vadd.f32 %v1670_v38, %v1669_v15 }
 0x27e   : > { %v1672_v52 = vrot.slane %v1671_v21, 2 }
 0x280   : > { %v1673_v28 = vadd.f32 %v1672_v52, %v1671_v21 }
 0x281   : > { %v1680_v33 = vpop.xlane.xlu0 %1679 }
 0x282   : > { %v1681_v41 = vrot.slane %v1680_v33, 4  ;;  %v1674_v59 = vrot.slane %v1673_v28, 1 }
 0x284   : > { %v1682_v46 = vadd.f32 %v1681_v41, %v1680_v33  ;;  %v1675_v23 = vadd.f32 %v1674_v59, %v1673_v28 }
 0x286   : > { %v1683_v3 = vrot.slane %v1682_v46, 2  ;;  %1889 = vpush %v1675_v23 }
 0x288   : > { %v1684_v50 = vadd.f32 %v1683_v3, %v1682_v46 }
 0x28a   : > { %v1685_v61 = vrot.slane %v1684_v50, 1 }
 0x28c   : > { %v1686_v54 = vadd.f32 %v1685_v61, %v1684_v50 }
 0x28e   : > { %1891 = vpush %v1686_v54 }
 0x2b7   : > { %s1890_s12 = spop %1889 }
 0x2bf   : > { %s1892_s13 = spop %1891 }
 0x2c0   : > { %s1688_s14 = ssub.f32 %s1890_s12, %s1892_s13 }
 0x2c2   : > { %1690 = sst [smem:[#allocation4]] %s1688_s14 }
 0x2c3 PF: > { %p1897_p9 = scmp.eq.s32.totalorder %s1800_s18, 2  ;;  %s1698_s21 = sshll.u32 %s2904_s4, 4  ;;  %s1699_s21 = int_to_ptr.hbm [resolvable:$true] %s1698_s21 }
 0x2c4   : > { %s2144_s22 = smov [#allocation4]  }
 0x2c5   : > { %1894 = dma.smem_to_hbm (%p1897_p9), %s2144_s22, 16, %s1699_s21, [#allocation5]  }
 0x2c6   : > { %2126 = dma.done.wait (%p1897_p9), [#allocation5], 16  }
 0x2c7   : > { %2128 = vsyncadd (%p1897_p9), [#allocation5], 4294967280 }
 0x2c8   : > { %1707 = sfence }
 0x2c9 PF: > { %s15_s17 = sadd.s32 1, %s2139_s17   ;;  %s2905_s15 = smov %s2135_s16 }
 0x2ca   : > { %p12_p10 = scmp.ge.s32.totalorder %s15_s17, 5   ;;  %s2906_s16 = smov %s2908_s19 }
 0x2cc   :  { %14 = sbr.rel (!%p12_p10) target bundleno = 2 (0x2), region = 89 }
 0x2d1   :  { %1713 = vsyncpa [#allocation5], 1 }
 0x2d2   :  { %1715 = vsyncpa [#allocation5 + $0x1], 1 }

</bundles_post_ra>
